<compile_context>
chip_gen: v6e
topology: v6e:2x2x1
jax: 0.10.0
libtpu: 0.0.40
codegen_flags: <defaults>
</compile_context>

<pallas_src>
import math

import jax
import jax.numpy as jnp
from jax import lax
from jax.experimental import pallas as pl
from jax.experimental.pallas import tpu as pltpu

# ----------------------- config (tiny, Qwen-shaped) -------------------------
B = 2            # batch
S = 8            # seq len
D = 32           # hidden size
H = 4            # attention heads
HD = D // H      # head dim
I = 64           # MLP intermediate size
V = 64           # vocab size
L = 2            # transformer layers
LORA_R = 16
LORA_ALPHA = 32
LORA_SCALE = LORA_ALPHA / LORA_R
NUM_CLASSES = 2
NUM_ATTRIBUTION_LABELS = 5
HEAD_PAD = 128   # fused head output padded to a full lane width
RMS_EPS = 1e-6
ATTN_SCALE = 1.0 / math.sqrt(HD)
QKV_W = 5 * HD   # per-head fused projection width: qa | qb | ka | kb | v


# ----------------------------- kernel helpers -------------------------------
def _rmsnorm(h, w):
    # h: (N, D) f32; w: (1, D) f32
    var = jnp.mean(h * h, axis=-1, keepdims=True)
    return h * lax.rsqrt(var + RMS_EPS) * w


# --------------------------- fused forward kernel ---------------------------
def fused_model_kernel(x0_ref, bias_ref, cos_ref, sin_ref,
                       ln1_ref, wqkv_ref, wo_ref,
                       ln2_ref, wgu_ref, wd_ref,
                       fln_ref, wh_ref, bh_ref,
                       out_ref):
    # One program per batch row (grid axis marked "parallel" -> 2nd TC on v7x).
    x = x0_ref[0]                       # (S, D) f32 residual stream
    bias = bias_ref[0]                  # (1, S, S) additive causal+padding mask
    cos = cos_ref[...]                  # (S, HD) f32
    sin = sin_ref[...]

    def layer(l, x):
        # ---- self-attention (LoRA + rotate_half folded into per-head weights) ----
        hn = _rmsnorm(x, ln1_ref[l]).astype(jnp.bfloat16)              # (S, D)
        hn_h = jnp.broadcast_to(hn[None], (H, S, D))                   # (H, S, D)
        proj = jnp.einsum('hsd,hde->hse', hn_h, wqkv_ref[l],
                          preferred_element_type=jnp.float32)          # (H, S, 5*HD)
        qa = proj[:, :, 0 * HD:1 * HD]
        qb = proj[:, :, 1 * HD:2 * HD]
        ka = proj[:, :, 2 * HD:3 * HD]
        kb = proj[:, :, 3 * HD:4 * HD]
        vh = proj[:, :, 4 * HD:5 * HD]
        qh = (qa * cos + qb * sin) * ATTN_SCALE                        # RoPE (fused rot)
        kh = ka * cos + kb * sin

        s = jnp.einsum('hqd,hkd->hqk', qh.astype(jnp.bfloat16),
                       kh.astype(jnp.bfloat16),
                       preferred_element_type=jnp.float32)             # (H, S, S)
        s = s + bias                                                   # broadcast over heads
        # no max-subtraction: scores are O(1) here and -1e30 underflows exp to 0
        p = jnp.exp(s)
        p = p * pl.reciprocal(jnp.sum(p, axis=-1, keepdims=True), approx=True)
        ctx = jnp.einsum('hqk,hkd->hqd', p.astype(jnp.bfloat16),
                         vh.astype(jnp.bfloat16),
                         preferred_element_type=jnp.float32)           # (H, S, HD)
        attn = jnp.einsum('hqd,hde->hqe', ctx.astype(jnp.bfloat16), wo_ref[l],
                          preferred_element_type=jnp.float32)          # (H, S, D)
        x = x + jnp.sum(attn, axis=0)                                  # sum heads + residual

        # ---- SwiGLU MLP (gate|up fused into one (D, 2I)=(32,128) matmul) ----
        hn2 = _rmsnorm(x, ln2_ref[l]).astype(jnp.bfloat16)
        gu = jnp.dot(hn2, wgu_ref[l], preferred_element_type=jnp.float32)   # (S, 2I)
        g = gu[:, :I]
        u = gu[:, I:]
        act = (g * jax.nn.sigmoid(g) * u).astype(jnp.bfloat16)         # SiLU(g) * u
        x = x + jnp.dot(act, wd_ref[l], preferred_element_type=jnp.float32)
        return x

    x = lax.fori_loop(0, L, layer, x, unroll=True)

    # ---- final RMSNorm + last-token pooling + fused heads (lane-dense store) ----
    pooled = x[S - 1:S, :]                                             # (1, D), pos S-1 as in ref
    hnp = _rmsnorm(pooled, fln_ref[...]).astype(jnp.bfloat16)
    out_ref[0] = (jnp.dot(hnp, wh_ref[...], preferred_element_type=jnp.float32)
                  + bh_ref[...])                                       # (1, HEAD_PAD)


# ------------------------------- pallas wrapper ------------------------------
def run_fused(x0, bias, p):
    def const(shape):
        nd = len(shape)
        return pl.BlockSpec(shape, lambda b, _nd=nd: (0,) * _nd)

    grid_spec = pltpu.PrefetchScalarGridSpec(
        num_scalar_prefetch=0,
        grid=(B,),
        in_specs=[
            pl.BlockSpec((1, S, D), lambda b: (b, 0, 0)),           # x0 (embeddings)
            pl.BlockSpec((1, 1, S, S), lambda b: (b, 0, 0, 0)),     # additive mask bias
            const((S, HD)),                                         # cos
            const((S, HD)),                                         # sin
            const((L, 1, D)),                                       # ln1 (all layers)
            const((L, H, D, QKV_W)),                                # fused qa|qb|ka|kb|v per head
            const((L, H, HD, D)),                                   # per-head o_proj
            const((L, 1, D)),                                       # ln2
            const((L, D, 2 * I)),                                   # gate|up fused
            const((L, I, D)),                                       # down
            const((1, D)),                                          # final RMSNorm weight
            const((D, HEAD_PAD)),                                   # fused class|attr head
            const((1, HEAD_PAD)),                                   # fused head bias
        ],
        out_specs=pl.BlockSpec((1, 1, HEAD_PAD), lambda b: (b, 0, 0)),
    )

    out = pl.pallas_call(
        fused_model_kernel,
        out_shape=jax.ShapeDtypeStruct((B, 1, HEAD_PAD), jnp.float32),
        grid_spec=grid_spec,
        compiler_params=pltpu.CompilerParams(
            dimension_semantics=("parallel",)),
    )(x0, bias, p['cos'], p['sin'],
      p['ln1'], p['wqkv'], p['wo'], p['ln2'], p['wgu'], p['wd'],
      p['final_ln'], p['w_heads'], p['b_heads'])
    return out.reshape(B, HEAD_PAD)


# ----------------------------- parameter setup ------------------------------
def _init(key, shape, fan_in):
    return (jax.random.normal(key, shape, dtype=jnp.float32)
            / math.sqrt(max(fan_in, 1)))


def make_params(seed=0):
    key = jax.random.PRNGKey(seed)
    keys = iter(jax.random.split(key, 256))

    def lora_folded(din, dout):
        # eval-mode LoRA (dropout identity) folded into the base weight
        w = _init(next(keys), (din, dout), din)
        a = _init(next(keys), (din, LORA_R), din)
        b = _init(next(keys), (LORA_R, dout), LORA_R) * 0.1
        return w + LORA_SCALE * (a @ b)

    # rotate_half of one head as a signed block permutation (folded into weights)
    half = HD // 2
    eye = jnp.eye(half, dtype=jnp.float32)
    zero = jnp.zeros((half, half), jnp.float32)
    r_head = jnp.concatenate(
        [jnp.concatenate([zero, eye], axis=1),
         jnp.concatenate([-eye, zero], axis=1)], axis=0)             # (HD, HD)

    ln1, wqkv, wo, ln2, wgu, wd = [], [], [], [], [], []
    for _ in range(L):
        wq = lora_folded(D, D)
        wk = lora_folded(D, D)
        wv = lora_folded(D, D)
        wo_l = lora_folded(D, D)
        wg = lora_folded(D, I)
        wu = lora_folded(D, I)
        wd_l = lora_folded(I, D)

        per_head = []
        for h in range(H):
            sl = slice(h * HD, (h + 1) * HD)
            qa = wq[:, sl]
            ka = wk[:, sl]
            per_head.append(jnp.concatenate(
                [qa, qa @ r_head, ka, ka @ r_head, wv[:, sl]], axis=1))  # (D, 5*HD)
        wqkv.append(jnp.stack(per_head, axis=0))                     # (H, D, 5*HD)
        wo.append(wo_l.reshape(H, HD, D))                            # per-head o_proj
        wgu.append(jnp.concatenate([wg, wu], axis=1))                # (D, 2I) lane-dense
        wd.append(wd_l)
        ln1.append(jnp.ones((1, D), jnp.float32))
        ln2.append(jnp.ones((1, D), jnp.float32))

    # RoPE tables for one head (identical across heads/batch)
    pos = jnp.arange(S, dtype=jnp.float32)
    inv_freq = 1.0 / (10000.0 ** (jnp.arange(0, HD, 2, dtype=jnp.float32) / HD))
    freqs = pos[:, None] * inv_freq[None, :]                         # (S, HD/2)
    emb = jnp.concatenate([freqs, freqs], axis=-1)                   # (S, HD)

    # classification + attribution heads fused and lane-padded to 128
    wc = _init(next(keys), (D, NUM_CLASSES), D)
    wa = _init(next(keys), (D, NUM_ATTRIBUTION_LABELS), D)
    w_heads = jnp.zeros((D, HEAD_PAD), jnp.float32)
    w_heads = w_heads.at[:, :NUM_CLASSES].set(wc)
    w_heads = w_heads.at[:, NUM_CLASSES:NUM_CLASSES + NUM_ATTRIBUTION_LABELS].set(wa)

    bf16 = jnp.bfloat16
    return {
        'embedding': _init(next(keys), (V, D), 1) * 0.1,
        'cos': jnp.cos(emb), 'sin': jnp.sin(emb),
        'ln1': jnp.stack(ln1), 'ln2': jnp.stack(ln2),
        'wqkv': jnp.stack(wqkv).astype(bf16),
        'wo': jnp.stack(wo).astype(bf16),
        'wgu': jnp.stack(wgu).astype(bf16),
        'wd': jnp.stack(wd).astype(bf16),
        'final_ln': jnp.ones((1, D), jnp.float32),
        'w_heads': w_heads.astype(bf16),
        'b_heads': jnp.zeros((1, HEAD_PAD), jnp.float32),
    }


# ------------------------------- full forward -------------------------------
@jax.jit
def safd_forward(input_ids, attention_mask, params):
    # embedding lookup is glue (gather); the whole transformer runs in one kernel
    x0 = jnp.take(params['embedding'], input_ids, axis=0).astype(jnp.float32)  # (B,S,D)

    # causal + key-padding additive bias, built once outside the kernel
    key_valid = attention_mask.astype(jnp.int32) > 0                  # (B, S)
    causal = jnp.tril(jnp.ones((S, S), dtype=bool))
    allowed = jnp.logical_and(causal[None, :, :], key_valid[:, None, :])
    bias = jnp.where(allowed, 0.0, -1e30).astype(jnp.float32)[:, None, :, :]   # (B,1,S,S)

    logits = run_fused(x0, bias, params)                              # (B, 128)
    class_logits = logits[:, :NUM_CLASSES]
    attr_logits = logits[:, NUM_CLASSES:NUM_CLASSES + NUM_ATTRIBUTION_LABELS]
    return class_logits, attr_logits


# ------------------------------------ main -----------------------------------
if __name__ == "__main__":
    key = jax.random.PRNGKey(0)
    k_ids, _ = jax.random.split(key)
    input_ids = jax.random.randint(k_ids, (B, S), 0, V, dtype=jnp.int32)
    attention_mask = jnp.ones((B, S), jnp.int32).at[1, 6:].set(0)  # pad tail of row 1

    params = make_params(seed=0)
    class_logits, attr_logits = safd_forward(input_ids, attention_mask, params)
    jax.block_until_ready((class_logits, attr_logits))

    assert class_logits.shape == (B, NUM_CLASSES)
    assert attr_logits.shape == (B, NUM_ATTRIBUTION_LABELS)
    assert bool(jnp.all(jnp.isfinite(class_logits))) and bool(jnp.all(jnp.isfinite(attr_logits)))
    print("KERNEL_OK")
</pallas_src>

<mosaic_0001>
module attributes {stable_mosaic.version = 11 : i64} {
  func.func @fused_model_kernel(%arg0: i32, %arg1: memref<1x8x32xf32, #tpu.memory_space<vmem>>, %arg2: memref<1x1x8x8xf32, #tpu.memory_space<vmem>>, %arg3: memref<8x8xf32, #tpu.memory_space<vmem>>, %arg4: memref<8x8xf32, #tpu.memory_space<vmem>>, %arg5: memref<2x1x32xf32, #tpu.memory_space<vmem>>, %arg6: memref<2x4x32x40xbf16, #tpu.memory_space<vmem>>, %arg7: memref<2x4x8x32xbf16, #tpu.memory_space<vmem>>, %arg8: memref<2x1x32xf32, #tpu.memory_space<vmem>>, %arg9: memref<2x32x128xbf16, #tpu.memory_space<vmem>>, %arg10: memref<2x64x32xbf16, #tpu.memory_space<vmem>>, %arg11: memref<1x32xf32, #tpu.memory_space<vmem>>, %arg12: memref<32x128xbf16, #tpu.memory_space<vmem>>, %arg13: memref<1x128xf32, #tpu.memory_space<vmem>>, %arg14: memref<1x1x128xf32, #tpu.memory_space<vmem>>) attributes {dimension_semantics = [#tpu.dimension_semantics<parallel>], iteration_bounds = array<i64: 2>, scalar_prefetch = 0 : i64, scratch_operands = 0 : i64, tpu.core_type = #tpu.core_type<tc>, window_params = [{transform_indices = @transform_0, window_bounds = array<i64: 1, 8, 32>}, {transform_indices = @transform_1, window_bounds = array<i64: 1, 1, 8, 8>}, {pipeline_mode = #tpu.pipeline_mode<synchronous>, transform_indices = @transform_2, window_bounds = array<i64: 8, 8>}, {pipeline_mode = #tpu.pipeline_mode<synchronous>, transform_indices = @transform_3, window_bounds = array<i64: 8, 8>}, {pipeline_mode = #tpu.pipeline_mode<synchronous>, transform_indices = @transform_4, window_bounds = array<i64: 2, 1, 32>}, {pipeline_mode = #tpu.pipeline_mode<synchronous>, transform_indices = @transform_5, window_bounds = array<i64: 2, 4, 32, 40>}, {pipeline_mode = #tpu.pipeline_mode<synchronous>, transform_indices = @transform_6, window_bounds = array<i64: 2, 4, 8, 32>}, {pipeline_mode = #tpu.pipeline_mode<synchronous>, transform_indices = @transform_7, window_bounds = array<i64: 2, 1, 32>}, {pipeline_mode = #tpu.pipeline_mode<synchronous>, transform_indices = @transform_8, window_bounds = array<i64: 2, 32, 128>}, {pipeline_mode = #tpu.pipeline_mode<synchronous>, transform_indices = @transform_9, window_bounds = array<i64: 2, 64, 32>}, {pipeline_mode = #tpu.pipeline_mode<synchronous>, transform_indices = @transform_10, window_bounds = array<i64: 1, 32>}, {pipeline_mode = #tpu.pipeline_mode<synchronous>, transform_indices = @transform_11, window_bounds = array<i64: 32, 128>}, {pipeline_mode = #tpu.pipeline_mode<synchronous>, transform_indices = @transform_12, window_bounds = array<i64: 1, 128>}, {transform_indices = @transform_13, window_bounds = array<i64: 1, 1, 128>}]} {
    %c0 = arith.constant 0 : index
    %c0_0 = arith.constant 0 : index
    %c0_1 = arith.constant 0 : index
    %0 = vector.load %arg1[%c0, %c0_0, %c0_1] : memref<1x8x32xf32, #tpu.memory_space<vmem>>, vector<1x8x32xf32>
    %1 = vector.shape_cast %0 : vector<1x8x32xf32> to vector<8x32xf32>
    %c0_2 = arith.constant 0 : index
    %c0_3 = arith.constant 0 : index
    %c0_4 = arith.constant 0 : index
    %c0_5 = arith.constant 0 : index
    %2 = vector.load %arg2[%c0_2, %c0_3, %c0_4, %c0_5] : memref<1x1x8x8xf32, #tpu.memory_space<vmem>>, vector<1x1x8x8xf32>
    %3 = vector.shape_cast %2 : vector<1x1x8x8xf32> to vector<1x8x8xf32>
    %c0_6 = arith.constant 0 : index
    %c0_7 = arith.constant 0 : index
    %4 = vector.load %arg3[%c0_6, %c0_7] : memref<8x8xf32, #tpu.memory_space<vmem>>, vector<8x8xf32>
    %c0_8 = arith.constant 0 : index
    %c0_9 = arith.constant 0 : index
    %5 = vector.load %arg4[%c0_8, %c0_9] : memref<8x8xf32, #tpu.memory_space<vmem>>, vector<8x8xf32>
    %c0_i32 = arith.constant 0 : i32
    %6 = arith.index_cast %c0_i32 : i32 to index
    %c0_10 = arith.constant 0 : index
    %c0_11 = arith.constant 0 : index
    %7 = vector.load %arg5[%6, %c0_10, %c0_11] : memref<2x1x32xf32, #tpu.memory_space<vmem>>, vector<1x1x32xf32>
    %8 = vector.shape_cast %7 : vector<1x1x32xf32> to vector<1x32xf32>
    %9 = arith.mulf %1, %1 : vector<8x32xf32>
    %cst = arith.constant dense<0.000000e+00> : vector<8xf32>
    %10 = vector.multi_reduction <add>, %9, %cst [1] : vector<8x32xf32> to vector<8xf32>
    %11 = vector.shape_cast %10 : vector<8xf32> to vector<8x1xf32>
    %cst_12 = arith.constant 3.200000e+01 : f32
    %12 = vector.broadcast %cst_12 : f32 to vector<8x1xf32>
    %13 = arith.divf %11, %12 : vector<8x1xf32>
    %cst_13 = arith.constant 9.99999997E-7 : f32
    %14 = vector.broadcast %cst_13 : f32 to vector<8x1xf32>
    %15 = arith.addf %13, %14 : vector<8x1xf32>
    %16 = math.rsqrt %15 : vector<8x1xf32>
    %17 = vector.broadcast %16 : vector<8x1xf32> to vector<8x32xf32>
    %18 = arith.mulf %1, %17 : vector<8x32xf32>
    %19 = vector.broadcast %8 : vector<1x32xf32> to vector<8x32xf32>
    %20 = arith.mulf %18, %19 : vector<8x32xf32>
    %21 = arith.truncf %20 : vector<8x32xf32> to vector<8x32xbf16>
    %22 = vector.shape_cast %21 : vector<8x32xbf16> to vector<1x8x32xbf16>
    %23 = vector.shape_cast %22 : vector<1x8x32xbf16> to vector<1x8x32xbf16>
    %24 = vector.broadcast %23 : vector<1x8x32xbf16> to vector<4x8x32xbf16>
    %25 = arith.index_cast %c0_i32 : i32 to index
    %c0_14 = arith.constant 0 : index
    %c0_15 = arith.constant 0 : index
    %c0_16 = arith.constant 0 : index
    %26 = vector.load %arg6[%25, %c0_14, %c0_15, %c0_16] : memref<2x4x32x40xbf16, #tpu.memory_space<vmem>>, vector<1x4x32x40xbf16>
    %27 = vector.shape_cast %26 : vector<1x4x32x40xbf16> to vector<4x32x40xbf16>
    "tpu.trace_start"() <{level = 10 : i32, message = "hsd,hde->hse"}> : () -> ()
    %cst_17 = arith.constant dense<0.000000e+00> : vector<4x8x40xf32>
    %28 = tpu.matmul %24, %27, %cst_17 {dimension_numbers = #tpu.dot_dimension_numbers<[2], [1], [1], [2], [0, 0, 0, 1, 1, 2], [0], [0]>} : vector<4x8x32xbf16>, vector<4x32x40xbf16>, vector<4x8x40xf32> -> vector<4x8x40xf32>
    "tpu.trace_stop"() : () -> ()
    %29 = vector.extract_strided_slice %28 {offsets = [0, 0, 0], sizes = [4, 8, 8], strides = [1, 1, 1]} : vector<4x8x40xf32> to vector<4x8x8xf32>
    %30 = vector.extract_strided_slice %28 {offsets = [0, 0, 8], sizes = [4, 8, 8], strides = [1, 1, 1]} : vector<4x8x40xf32> to vector<4x8x8xf32>
    %31 = vector.extract_strided_slice %28 {offsets = [0, 0, 16], sizes = [4, 8, 8], strides = [1, 1, 1]} : vector<4x8x40xf32> to vector<4x8x8xf32>
    %32 = vector.extract_strided_slice %28 {offsets = [0, 0, 24], sizes = [4, 8, 8], strides = [1, 1, 1]} : vector<4x8x40xf32> to vector<4x8x8xf32>
    %33 = vector.extract_strided_slice %28 {offsets = [0, 0, 32], sizes = [4, 8, 8], strides = [1, 1, 1]} : vector<4x8x40xf32> to vector<4x8x8xf32>
    %34 = vector.shape_cast %4 : vector<8x8xf32> to vector<1x8x8xf32>
    %35 = vector.broadcast %34 : vector<1x8x8xf32> to vector<4x8x8xf32>
    %36 = arith.mulf %29, %35 : vector<4x8x8xf32>
    %37 = vector.shape_cast %5 : vector<8x8xf32> to vector<1x8x8xf32>
    %38 = vector.broadcast %37 : vector<1x8x8xf32> to vector<4x8x8xf32>
    %39 = arith.mulf %30, %38 : vector<4x8x8xf32>
    %40 = arith.addf %36, %39 : vector<4x8x8xf32>
    %cst_18 = arith.constant 0.353553385 : f32
    %41 = vector.broadcast %cst_18 : f32 to vector<4x8x8xf32>
    %42 = arith.mulf %40, %41 : vector<4x8x8xf32>
    %43 = vector.shape_cast %4 : vector<8x8xf32> to vector<1x8x8xf32>
    %44 = vector.broadcast %43 : vector<1x8x8xf32> to vector<4x8x8xf32>
    %45 = arith.mulf %31, %44 : vector<4x8x8xf32>
    %46 = vector.shape_cast %5 : vector<8x8xf32> to vector<1x8x8xf32>
    %47 = vector.broadcast %46 : vector<1x8x8xf32> to vector<4x8x8xf32>
    %48 = arith.mulf %32, %47 : vector<4x8x8xf32>
    %49 = arith.addf %45, %48 : vector<4x8x8xf32>
    %50 = arith.truncf %42 : vector<4x8x8xf32> to vector<4x8x8xbf16>
    %51 = arith.truncf %49 : vector<4x8x8xf32> to vector<4x8x8xbf16>
    "tpu.trace_start"() <{level = 10 : i32, message = "hqd,hkd->hqk"}> : () -> ()
    %cst_19 = arith.constant dense<0.000000e+00> : vector<4x8x8xf32>
    %52 = tpu.matmul %50, %51, %cst_19 {dimension_numbers = #tpu.dot_dimension_numbers<[2], [2], [1], [1], [0, 0, 0, 1, 1, 1], [0], [0]>} : vector<4x8x8xbf16>, vector<4x8x8xbf16>, vector<4x8x8xf32> -> vector<4x8x8xf32>
    "tpu.trace_stop"() : () -> ()
    %53 = vector.broadcast %3 : vector<1x8x8xf32> to vector<4x8x8xf32>
    %54 = arith.addf %52, %53 : vector<4x8x8xf32>
    %55 = math.exp %54 : vector<4x8x8xf32>
    %cst_20 = arith.constant dense<0.000000e+00> : vector<4x8xf32>
    %56 = vector.multi_reduction <add>, %55, %cst_20 [2] : vector<4x8x8xf32> to vector<4x8xf32>
    %57 = vector.shape_cast %56 : vector<4x8xf32> to vector<4x8x1xf32>
    %58 = tpu.reciprocal %57 {approx = true} : vector<4x8x1xf32> -> vector<4x8x1xf32>
    %59 = vector.broadcast %58 : vector<4x8x1xf32> to vector<4x8x8xf32>
    %60 = arith.mulf %55, %59 : vector<4x8x8xf32>
    %61 = arith.truncf %60 : vector<4x8x8xf32> to vector<4x8x8xbf16>
    %62 = arith.truncf %33 : vector<4x8x8xf32> to vector<4x8x8xbf16>
    "tpu.trace_start"() <{level = 10 : i32, message = "hqk,hkd->hqd"}> : () -> ()
    %cst_21 = arith.constant dense<0.000000e+00> : vector<4x8x8xf32>
    %63 = tpu.matmul %61, %62, %cst_21 {dimension_numbers = #tpu.dot_dimension_numbers<[2], [1], [1], [2], [0, 0, 0, 1, 1, 2], [0], [0]>} : vector<4x8x8xbf16>, vector<4x8x8xbf16>, vector<4x8x8xf32> -> vector<4x8x8xf32>
    "tpu.trace_stop"() : () -> ()
    %64 = arith.truncf %63 : vector<4x8x8xf32> to vector<4x8x8xbf16>
    %65 = arith.index_cast %c0_i32 : i32 to index
    %c0_22 = arith.constant 0 : index
    %c0_23 = arith.constant 0 : index
    %c0_24 = arith.constant 0 : index
    %66 = vector.load %arg7[%65, %c0_22, %c0_23, %c0_24] : memref<2x4x8x32xbf16, #tpu.memory_space<vmem>>, vector<1x4x8x32xbf16>
    %67 = vector.shape_cast %66 : vector<1x4x8x32xbf16> to vector<4x8x32xbf16>
    "tpu.trace_start"() <{level = 10 : i32, message = "hqd,hde->hqe"}> : () -> ()
    %cst_25 = arith.constant dense<0.000000e+00> : vector<4x8x32xf32>
    %68 = tpu.matmul %64, %67, %cst_25 {dimension_numbers = #tpu.dot_dimension_numbers<[2], [1], [1], [2], [0, 0, 0, 1, 1, 2], [0], [0]>} : vector<4x8x8xbf16>, vector<4x8x32xbf16>, vector<4x8x32xf32> -> vector<4x8x32xf32>
    "tpu.trace_stop"() : () -> ()
    %cst_26 = arith.constant dense<0.000000e+00> : vector<8x32xf32>
    %69 = vector.multi_reduction <add>, %68, %cst_26 [0] : vector<4x8x32xf32> to vector<8x32xf32>
    %70 = arith.addf %1, %69 : vector<8x32xf32>
    %71 = arith.index_cast %c0_i32 : i32 to index
    %c0_27 = arith.constant 0 : index
    %c0_28 = arith.constant 0 : index
    %72 = vector.load %arg8[%71, %c0_27, %c0_28] : memref<2x1x32xf32, #tpu.memory_space<vmem>>, vector<1x1x32xf32>
    %73 = vector.shape_cast %72 : vector<1x1x32xf32> to vector<1x32xf32>
    %74 = arith.mulf %70, %70 : vector<8x32xf32>
    %cst_29 = arith.constant dense<0.000000e+00> : vector<8xf32>
    %75 = vector.multi_reduction <add>, %74, %cst_29 [1] : vector<8x32xf32> to vector<8xf32>
    %76 = vector.shape_cast %75 : vector<8xf32> to vector<8x1xf32>
    %cst_30 = arith.constant 3.200000e+01 : f32
    %77 = vector.broadcast %cst_30 : f32 to vector<8x1xf32>
    %78 = arith.divf %76, %77 : vector<8x1xf32>
    %cst_31 = arith.constant 9.99999997E-7 : f32
    %79 = vector.broadcast %cst_31 : f32 to vector<8x1xf32>
    %80 = arith.addf %78, %79 : vector<8x1xf32>
    %81 = math.rsqrt %80 : vector<8x1xf32>
    %82 = vector.broadcast %81 : vector<8x1xf32> to vector<8x32xf32>
    %83 = arith.mulf %70, %82 : vector<8x32xf32>
    %84 = vector.broadcast %73 : vector<1x32xf32> to vector<8x32xf32>
    %85 = arith.mulf %83, %84 : vector<8x32xf32>
    %86 = arith.truncf %85 : vector<8x32xf32> to vector<8x32xbf16>
    %87 = arith.index_cast %c0_i32 : i32 to index
    %c0_32 = arith.constant 0 : index
    %c0_33 = arith.constant 0 : index
    %88 = vector.load %arg9[%87, %c0_32, %c0_33] : memref<2x32x128xbf16, #tpu.memory_space<vmem>>, vector<1x32x128xbf16>
    %89 = vector.shape_cast %88 : vector<1x32x128xbf16> to vector<32x128xbf16>
    %cst_34 = arith.constant dense<0.000000e+00> : vector<8x128xf32>
    %90 = tpu.matmul %86, %89, %cst_34 {dimension_numbers = #tpu.dot_dimension_numbers<[1], [0], [0], [1], [0, 0, 1, 1], [], []>} : vector<8x32xbf16>, vector<32x128xbf16>, vector<8x128xf32> -> vector<8x128xf32>
    %91 = vector.extract_strided_slice %90 {offsets = [0, 0], sizes = [8, 64], strides = [1, 1]} : vector<8x128xf32> to vector<8x64xf32>
    %92 = vector.extract_strided_slice %90 {offsets = [0, 64], sizes = [8, 64], strides = [1, 1]} : vector<8x128xf32> to vector<8x64xf32>
    %93 = arith.negf %91 : vector<8x64xf32>
    %94 = math.exp %93 : vector<8x64xf32>
    %cst_35 = arith.constant 1.000000e+00 : f32
    %95 = vector.broadcast %cst_35 : f32 to vector<8x64xf32>
    %96 = arith.addf %95, %94 : vector<8x64xf32>
    %97 = arith.divf %95, %96 : vector<8x64xf32>
    %98 = arith.mulf %91, %97 : vector<8x64xf32>
    %99 = arith.mulf %98, %92 : vector<8x64xf32>
    %100 = arith.truncf %99 : vector<8x64xf32> to vector<8x64xbf16>
    %101 = arith.index_cast %c0_i32 : i32 to index
    %c0_36 = arith.constant 0 : index
    %c0_37 = arith.constant 0 : index
    %102 = vector.load %arg10[%101, %c0_36, %c0_37] : memref<2x64x32xbf16, #tpu.memory_space<vmem>>, vector<1x64x32xbf16>
    %103 = vector.shape_cast %102 : vector<1x64x32xbf16> to vector<64x32xbf16>
    %cst_38 = arith.constant dense<0.000000e+00> : vector<8x32xf32>
    %104 = tpu.matmul %100, %103, %cst_38 {dimension_numbers = #tpu.dot_dimension_numbers<[1], [0], [0], [1], [0, 0, 1, 1], [], []>} : vector<8x64xbf16>, vector<64x32xbf16>, vector<8x32xf32> -> vector<8x32xf32>
    %105 = arith.addf %70, %104 : vector<8x32xf32>
    %c1_i32 = arith.constant 1 : i32
    %106 = arith.index_cast %c1_i32 : i32 to index
    %c0_39 = arith.constant 0 : index
    %c0_40 = arith.constant 0 : index
    %107 = vector.load %arg5[%106, %c0_39, %c0_40] : memref<2x1x32xf32, #tpu.memory_space<vmem>>, vector<1x1x32xf32>
    %108 = vector.shape_cast %107 : vector<1x1x32xf32> to vector<1x32xf32>
    %109 = arith.mulf %105, %105 : vector<8x32xf32>
    %cst_41 = arith.constant dense<0.000000e+00> : vector<8xf32>
    %110 = vector.multi_reduction <add>, %109, %cst_41 [1] : vector<8x32xf32> to vector<8xf32>
    %111 = vector.shape_cast %110 : vector<8xf32> to vector<8x1xf32>
    %cst_42 = arith.constant 3.200000e+01 : f32
    %112 = vector.broadcast %cst_42 : f32 to vector<8x1xf32>
    %113 = arith.divf %111, %112 : vector<8x1xf32>
    %cst_43 = arith.constant 9.99999997E-7 : f32
    %114 = vector.broadcast %cst_43 : f32 to vector<8x1xf32>
    %115 = arith.addf %113, %114 : vector<8x1xf32>
    %116 = math.rsqrt %115 : vector<8x1xf32>
    %117 = vector.broadcast %116 : vector<8x1xf32> to vector<8x32xf32>
    %118 = arith.mulf %105, %117 : vector<8x32xf32>
    %119 = vector.broadcast %108 : vector<1x32xf32> to vector<8x32xf32>
    %120 = arith.mulf %118, %119 : vector<8x32xf32>
    %121 = arith.truncf %120 : vector<8x32xf32> to vector<8x32xbf16>
    %122 = vector.shape_cast %121 : vector<8x32xbf16> to vector<1x8x32xbf16>
    %123 = vector.shape_cast %122 : vector<1x8x32xbf16> to vector<1x8x32xbf16>
    %124 = vector.broadcast %123 : vector<1x8x32xbf16> to vector<4x8x32xbf16>
    %125 = arith.index_cast %c1_i32 : i32 to index
    %c0_44 = arith.constant 0 : index
    %c0_45 = arith.constant 0 : index
    %c0_46 = arith.constant 0 : index
    %126 = vector.load %arg6[%125, %c0_44, %c0_45, %c0_46] : memref<2x4x32x40xbf16, #tpu.memory_space<vmem>>, vector<1x4x32x40xbf16>
    %127 = vector.shape_cast %126 : vector<1x4x32x40xbf16> to vector<4x32x40xbf16>
    "tpu.trace_start"() <{level = 10 : i32, message = "hsd,hde->hse"}> : () -> ()
    %cst_47 = arith.constant dense<0.000000e+00> : vector<4x8x40xf32>
    %128 = tpu.matmul %124, %127, %cst_47 {dimension_numbers = #tpu.dot_dimension_numbers<[2], [1], [1], [2], [0, 0, 0, 1, 1, 2], [0], [0]>} : vector<4x8x32xbf16>, vector<4x32x40xbf16>, vector<4x8x40xf32> -> vector<4x8x40xf32>
    "tpu.trace_stop"() : () -> ()
    %129 = vector.extract_strided_slice %128 {offsets = [0, 0, 0], sizes = [4, 8, 8], strides = [1, 1, 1]} : vector<4x8x40xf32> to vector<4x8x8xf32>
    %130 = vector.extract_strided_slice %128 {offsets = [0, 0, 8], sizes = [4, 8, 8], strides = [1, 1, 1]} : vector<4x8x40xf32> to vector<4x8x8xf32>
    %131 = vector.extract_strided_slice %128 {offsets = [0, 0, 16], sizes = [4, 8, 8], strides = [1, 1, 1]} : vector<4x8x40xf32> to vector<4x8x8xf32>
    %132 = vector.extract_strided_slice %128 {offsets = [0, 0, 24], sizes = [4, 8, 8], strides = [1, 1, 1]} : vector<4x8x40xf32> to vector<4x8x8xf32>
    %133 = vector.extract_strided_slice %128 {offsets = [0, 0, 32], sizes = [4, 8, 8], strides = [1, 1, 1]} : vector<4x8x40xf32> to vector<4x8x8xf32>
    %134 = vector.shape_cast %4 : vector<8x8xf32> to vector<1x8x8xf32>
    %135 = vector.broadcast %134 : vector<1x8x8xf32> to vector<4x8x8xf32>
    %136 = arith.mulf %129, %135 : vector<4x8x8xf32>
    %137 = vector.shape_cast %5 : vector<8x8xf32> to vector<1x8x8xf32>
    %138 = vector.broadcast %137 : vector<1x8x8xf32> to vector<4x8x8xf32>
    %139 = arith.mulf %130, %138 : vector<4x8x8xf32>
    %140 = arith.addf %136, %139 : vector<4x8x8xf32>
    %cst_48 = arith.constant 0.353553385 : f32
    %141 = vector.broadcast %cst_48 : f32 to vector<4x8x8xf32>
    %142 = arith.mulf %140, %141 : vector<4x8x8xf32>
    %143 = vector.shape_cast %4 : vector<8x8xf32> to vector<1x8x8xf32>
    %144 = vector.broadcast %143 : vector<1x8x8xf32> to vector<4x8x8xf32>
    %145 = arith.mulf %131, %144 : vector<4x8x8xf32>
    %146 = vector.shape_cast %5 : vector<8x8xf32> to vector<1x8x8xf32>
    %147 = vector.broadcast %146 : vector<1x8x8xf32> to vector<4x8x8xf32>
    %148 = arith.mulf %132, %147 : vector<4x8x8xf32>
    %149 = arith.addf %145, %148 : vector<4x8x8xf32>
    %150 = arith.truncf %142 : vector<4x8x8xf32> to vector<4x8x8xbf16>
    %151 = arith.truncf %149 : vector<4x8x8xf32> to vector<4x8x8xbf16>
    "tpu.trace_start"() <{level = 10 : i32, message = "hqd,hkd->hqk"}> : () -> ()
    %cst_49 = arith.constant dense<0.000000e+00> : vector<4x8x8xf32>
    %152 = tpu.matmul %150, %151, %cst_49 {dimension_numbers = #tpu.dot_dimension_numbers<[2], [2], [1], [1], [0, 0, 0, 1, 1, 1], [0], [0]>} : vector<4x8x8xbf16>, vector<4x8x8xbf16>, vector<4x8x8xf32> -> vector<4x8x8xf32>
    "tpu.trace_stop"() : () -> ()
    %153 = vector.broadcast %3 : vector<1x8x8xf32> to vector<4x8x8xf32>
    %154 = arith.addf %152, %153 : vector<4x8x8xf32>
    %155 = math.exp %154 : vector<4x8x8xf32>
    %cst_50 = arith.constant dense<0.000000e+00> : vector<4x8xf32>
    %156 = vector.multi_reduction <add>, %155, %cst_50 [2] : vector<4x8x8xf32> to vector<4x8xf32>
    %157 = vector.shape_cast %156 : vector<4x8xf32> to vector<4x8x1xf32>
    %158 = tpu.reciprocal %157 {approx = true} : vector<4x8x1xf32> -> vector<4x8x1xf32>
    %159 = vector.broadcast %158 : vector<4x8x1xf32> to vector<4x8x8xf32>
    %160 = arith.mulf %155, %159 : vector<4x8x8xf32>
    %161 = arith.truncf %160 : vector<4x8x8xf32> to vector<4x8x8xbf16>
    %162 = arith.truncf %133 : vector<4x8x8xf32> to vector<4x8x8xbf16>
    "tpu.trace_start"() <{level = 10 : i32, message = "hqk,hkd->hqd"}> : () -> ()
    %cst_51 = arith.constant dense<0.000000e+00> : vector<4x8x8xf32>
    %163 = tpu.matmul %161, %162, %cst_51 {dimension_numbers = #tpu.dot_dimension_numbers<[2], [1], [1], [2], [0, 0, 0, 1, 1, 2], [0], [0]>} : vector<4x8x8xbf16>, vector<4x8x8xbf16>, vector<4x8x8xf32> -> vector<4x8x8xf32>
    "tpu.trace_stop"() : () -> ()
    %164 = arith.truncf %163 : vector<4x8x8xf32> to vector<4x8x8xbf16>
    %165 = arith.index_cast %c1_i32 : i32 to index
    %c0_52 = arith.constant 0 : index
    %c0_53 = arith.constant 0 : index
    %c0_54 = arith.constant 0 : index
    %166 = vector.load %arg7[%165, %c0_52, %c0_53, %c0_54] : memref<2x4x8x32xbf16, #tpu.memory_space<vmem>>, vector<1x4x8x32xbf16>
    %167 = vector.shape_cast %166 : vector<1x4x8x32xbf16> to vector<4x8x32xbf16>
    "tpu.trace_start"() <{level = 10 : i32, message = "hqd,hde->hqe"}> : () -> ()
    %cst_55 = arith.constant dense<0.000000e+00> : vector<4x8x32xf32>
    %168 = tpu.matmul %164, %167, %cst_55 {dimension_numbers = #tpu.dot_dimension_numbers<[2], [1], [1], [2], [0, 0, 0, 1, 1, 2], [0], [0]>} : vector<4x8x8xbf16>, vector<4x8x32xbf16>, vector<4x8x32xf32> -> vector<4x8x32xf32>
    "tpu.trace_stop"() : () -> ()
    %cst_56 = arith.constant dense<0.000000e+00> : vector<8x32xf32>
    %169 = vector.multi_reduction <add>, %168, %cst_56 [0] : vector<4x8x32xf32> to vector<8x32xf32>
    %170 = arith.addf %105, %169 : vector<8x32xf32>
    %171 = arith.index_cast %c1_i32 : i32 to index
    %c0_57 = arith.constant 0 : index
    %c0_58 = arith.constant 0 : index
    %172 = vector.load %arg8[%171, %c0_57, %c0_58] : memref<2x1x32xf32, #tpu.memory_space<vmem>>, vector<1x1x32xf32>
    %173 = vector.shape_cast %172 : vector<1x1x32xf32> to vector<1x32xf32>
    %174 = arith.mulf %170, %170 : vector<8x32xf32>
    %cst_59 = arith.constant dense<0.000000e+00> : vector<8xf32>
    %175 = vector.multi_reduction <add>, %174, %cst_59 [1] : vector<8x32xf32> to vector<8xf32>
    %176 = vector.shape_cast %175 : vector<8xf32> to vector<8x1xf32>
    %cst_60 = arith.constant 3.200000e+01 : f32
    %177 = vector.broadcast %cst_60 : f32 to vector<8x1xf32>
    %178 = arith.divf %176, %177 : vector<8x1xf32>
    %cst_61 = arith.constant 9.99999997E-7 : f32
    %179 = vector.broadcast %cst_61 : f32 to vector<8x1xf32>
    %180 = arith.addf %178, %179 : vector<8x1xf32>
    %181 = math.rsqrt %180 : vector<8x1xf32>
    %182 = vector.broadcast %181 : vector<8x1xf32> to vector<8x32xf32>
    %183 = arith.mulf %170, %182 : vector<8x32xf32>
    %184 = vector.broadcast %173 : vector<1x32xf32> to vector<8x32xf32>
    %185 = arith.mulf %183, %184 : vector<8x32xf32>
    %186 = arith.truncf %185 : vector<8x32xf32> to vector<8x32xbf16>
    %187 = arith.index_cast %c1_i32 : i32 to index
    %c0_62 = arith.constant 0 : index
    %c0_63 = arith.constant 0 : index
    %188 = vector.load %arg9[%187, %c0_62, %c0_63] : memref<2x32x128xbf16, #tpu.memory_space<vmem>>, vector<1x32x128xbf16>
    %189 = vector.shape_cast %188 : vector<1x32x128xbf16> to vector<32x128xbf16>
    %cst_64 = arith.constant dense<0.000000e+00> : vector<8x128xf32>
    %190 = tpu.matmul %186, %189, %cst_64 {dimension_numbers = #tpu.dot_dimension_numbers<[1], [0], [0], [1], [0, 0, 1, 1], [], []>} : vector<8x32xbf16>, vector<32x128xbf16>, vector<8x128xf32> -> vector<8x128xf32>
    %191 = vector.extract_strided_slice %190 {offsets = [0, 0], sizes = [8, 64], strides = [1, 1]} : vector<8x128xf32> to vector<8x64xf32>
    %192 = vector.extract_strided_slice %190 {offsets = [0, 64], sizes = [8, 64], strides = [1, 1]} : vector<8x128xf32> to vector<8x64xf32>
    %193 = arith.negf %191 : vector<8x64xf32>
    %194 = math.exp %193 : vector<8x64xf32>
    %cst_65 = arith.constant 1.000000e+00 : f32
    %195 = vector.broadcast %cst_65 : f32 to vector<8x64xf32>
    %196 = arith.addf %195, %194 : vector<8x64xf32>
    %197 = arith.divf %195, %196 : vector<8x64xf32>
    %198 = arith.mulf %191, %197 : vector<8x64xf32>
    %199 = arith.mulf %198, %192 : vector<8x64xf32>
    %200 = arith.truncf %199 : vector<8x64xf32> to vector<8x64xbf16>
    %201 = arith.index_cast %c1_i32 : i32 to index
    %c0_66 = arith.constant 0 : index
    %c0_67 = arith.constant 0 : index
    %202 = vector.load %arg10[%201, %c0_66, %c0_67] : memref<2x64x32xbf16, #tpu.memory_space<vmem>>, vector<1x64x32xbf16>
    %203 = vector.shape_cast %202 : vector<1x64x32xbf16> to vector<64x32xbf16>
    %cst_68 = arith.constant dense<0.000000e+00> : vector<8x32xf32>
    %204 = tpu.matmul %200, %203, %cst_68 {dimension_numbers = #tpu.dot_dimension_numbers<[1], [0], [0], [1], [0, 0, 1, 1], [], []>} : vector<8x64xbf16>, vector<64x32xbf16>, vector<8x32xf32> -> vector<8x32xf32>
    %205 = arith.addf %170, %204 : vector<8x32xf32>
    %c2_i32 = arith.constant 2 : i32
    %206 = vector.extract_strided_slice %205 {offsets = [7, 0], sizes = [1, 32], strides = [1, 1]} : vector<8x32xf32> to vector<1x32xf32>
    %c0_69 = arith.constant 0 : index
    %c0_70 = arith.constant 0 : index
    %207 = vector.load %arg11[%c0_69, %c0_70] : memref<1x32xf32, #tpu.memory_space<vmem>>, vector<1x32xf32>
    %208 = arith.mulf %206, %206 : vector<1x32xf32>
    %cst_71 = arith.constant dense<0.000000e+00> : vector<1xf32>
    %209 = vector.multi_reduction <add>, %208, %cst_71 [1] : vector<1x32xf32> to vector<1xf32>
    %210 = vector.shape_cast %209 : vector<1xf32> to vector<1x1xf32>
    %cst_72 = arith.constant 3.200000e+01 : f32
    %211 = vector.broadcast %cst_72 : f32 to vector<1x1xf32>
    %212 = arith.divf %210, %211 : vector<1x1xf32>
    %cst_73 = arith.constant 9.99999997E-7 : f32
    %213 = vector.broadcast %cst_73 : f32 to vector<1x1xf32>
    %214 = arith.addf %212, %213 : vector<1x1xf32>
    %215 = math.rsqrt %214 : vector<1x1xf32>
    %216 = vector.broadcast %215 : vector<1x1xf32> to vector<1x32xf32>
    %217 = arith.mulf %206, %216 : vector<1x32xf32>
    %218 = arith.mulf %217, %207 : vector<1x32xf32>
    %219 = arith.truncf %218 : vector<1x32xf32> to vector<1x32xbf16>
    %c0_74 = arith.constant 0 : index
    %c0_75 = arith.constant 0 : index
    %220 = vector.load %arg12[%c0_74, %c0_75] : memref<32x128xbf16, #tpu.memory_space<vmem>>, vector<32x128xbf16>
    %cst_76 = arith.constant dense<0.000000e+00> : vector<1x128xf32>
    %221 = tpu.matmul %219, %220, %cst_76 {dimension_numbers = #tpu.dot_dimension_numbers<[1], [0], [0], [1], [0, 0, 1, 1], [], []>} : vector<1x32xbf16>, vector<32x128xbf16>, vector<1x128xf32> -> vector<1x128xf32>
    %c0_77 = arith.constant 0 : index
    %c0_78 = arith.constant 0 : index
    %222 = vector.load %arg13[%c0_77, %c0_78] : memref<1x128xf32, #tpu.memory_space<vmem>>, vector<1x128xf32>
    %223 = arith.addf %221, %222 : vector<1x128xf32>
    %c0_79 = arith.constant 0 : index
    %c0_80 = arith.constant 0 : index
    %c0_81 = arith.constant 0 : index
    %224 = vector.load %arg14[%c0_79, %c0_80, %c0_81] : memref<1x1x128xf32, #tpu.memory_space<vmem>>, vector<1x1x128xf32>
    %225 = vector.shape_cast %224 : vector<1x1x128xf32> to vector<1x128xf32>
    %226 = vector.shape_cast %223 : vector<1x128xf32> to vector<1x1x128xf32>
    tpu.vector_store %arg14[%c0_79, %c0_80, %c0_81], %226 {strides = array<i32>} : memref<1x1x128xf32, #tpu.memory_space<vmem>>, vector<1x1x128xf32>,
    return
  }
  func.func @transform_0(%arg0: i32) -> (i32, i32, i32) {
    %c0_i32 = arith.constant 0 : i32
    %c0_i32_0 = arith.constant 0 : i32
    %c0_i32_1 = arith.constant 0 : i32
    return %arg0, %c0_i32, %c0_i32_0 : i32, i32, i32
  }
  func.func @transform_1(%arg0: i32) -> (i32, i32, i32, i32) {
    %c0_i32 = arith.constant 0 : i32
    %c0_i32_0 = arith.constant 0 : i32
    %c0_i32_1 = arith.constant 0 : i32
    %c0_i32_2 = arith.constant 0 : i32
    return %arg0, %c0_i32, %c0_i32_0, %c0_i32_1 : i32, i32, i32, i32
  }
  func.func @transform_2(%arg0: i32) -> (i32, i32) {
    %c0_i32 = arith.constant 0 : i32
    %c0_i32_0 = arith.constant 0 : i32
    %c0_i32_1 = arith.constant 0 : i32
    return %c0_i32, %c0_i32_0 : i32, i32
  }
  func.func @transform_3(%arg0: i32) -> (i32, i32) {
    %c0_i32 = arith.constant 0 : i32
    %c0_i32_0 = arith.constant 0 : i32
    %c0_i32_1 = arith.constant 0 : i32
    return %c0_i32, %c0_i32_0 : i32, i32
  }
  func.func @transform_4(%arg0: i32) -> (i32, i32, i32) {
    %c0_i32 = arith.constant 0 : i32
    %c0_i32_0 = arith.constant 0 : i32
    %c0_i32_1 = arith.constant 0 : i32
    %c0_i32_2 = arith.constant 0 : i32
    return %c0_i32, %c0_i32_0, %c0_i32_1 : i32, i32, i32
  }
  func.func @transform_5(%arg0: i32) -> (i32, i32, i32, i32) {
    %c0_i32 = arith.constant 0 : i32
    %c0_i32_0 = arith.constant 0 : i32
    %c0_i32_1 = arith.constant 0 : i32
    %c0_i32_2 = arith.constant 0 : i32
    %c0_i32_3 = arith.constant 0 : i32
    return %c0_i32, %c0_i32_0, %c0_i32_1, %c0_i32_2 : i32, i32, i32, i32
  }
  func.func @transform_6(%arg0: i32) -> (i32, i32, i32, i32) {
    %c0_i32 = arith.constant 0 : i32
    %c0_i32_0 = arith.constant 0 : i32
    %c0_i32_1 = arith.constant 0 : i32
    %c0_i32_2 = arith.constant 0 : i32
    %c0_i32_3 = arith.constant 0 : i32
    return %c0_i32, %c0_i32_0, %c0_i32_1, %c0_i32_2 : i32, i32, i32, i32
  }
  func.func @transform_7(%arg0: i32) -> (i32, i32, i32) {
    %c0_i32 = arith.constant 0 : i32
    %c0_i32_0 = arith.constant 0 : i32
    %c0_i32_1 = arith.constant 0 : i32
    %c0_i32_2 = arith.constant 0 : i32
    return %c0_i32, %c0_i32_0, %c0_i32_1 : i32, i32, i32
  }
  func.func @transform_8(%arg0: i32) -> (i32, i32, i32) {
    %c0_i32 = arith.constant 0 : i32
    %c0_i32_0 = arith.constant 0 : i32
    %c0_i32_1 = arith.constant 0 : i32
    %c0_i32_2 = arith.constant 0 : i32
    return %c0_i32, %c0_i32_0, %c0_i32_1 : i32, i32, i32
  }
  func.func @transform_9(%arg0: i32) -> (i32, i32, i32) {
    %c0_i32 = arith.constant 0 : i32
    %c0_i32_0 = arith.constant 0 : i32
    %c0_i32_1 = arith.constant 0 : i32
    %c0_i32_2 = arith.constant 0 : i32
    return %c0_i32, %c0_i32_0, %c0_i32_1 : i32, i32, i32
  }
  func.func @transform_10(%arg0: i32) -> (i32, i32) {
    %c0_i32 = arith.constant 0 : i32
    %c0_i32_0 = arith.constant 0 : i32
    %c0_i32_1 = arith.constant 0 : i32
    return %c0_i32, %c0_i32_0 : i32, i32
  }
  func.func @transform_11(%arg0: i32) -> (i32, i32) {
    %c0_i32 = arith.constant 0 : i32
    %c0_i32_0 = arith.constant 0 : i32
    %c0_i32_1 = arith.constant 0 : i32
    return %c0_i32, %c0_i32_0 : i32, i32
  }
  func.func @transform_12(%arg0: i32) -> (i32, i32) {
    %c0_i32 = arith.constant 0 : i32
    %c0_i32_0 = arith.constant 0 : i32
    %c0_i32_1 = arith.constant 0 : i32
    return %c0_i32, %c0_i32_0 : i32, i32
  }
  func.func @transform_13(%arg0: i32) -> (i32, i32, i32) {
    %c0_i32 = arith.constant 0 : i32
    %c0_i32_0 = arith.constant 0 : i32
    %c0_i32_1 = arith.constant 0 : i32
    return %arg0, %c0_i32, %c0_i32_0 : i32, i32, i32
  }
}

</mosaic_0001>

<bundles_post_ra>
// kernel: safd_forward.1
= control target key start
LH: loop header
LB: loop body
LE: loop exit
PB: predicated region body
PF: predicated region fallthrough
CT: control target
= control target key end

     0   :  { %s3478_s25 = smov 0   ;;  %s3998_s0 = inlined_call_operand.vmem [shape: f32[2,8,32], index: 0, kind: input, shape index: {}]   ;;  %s3999_s1 = inlined_call_operand.vmem [shape: f32[2,1,8,8], index: 1, kind: input, shape index: {}]   ;;  %s4000_s2 = inlined_call_operand.vmem [shape: f32[8,8], index: 2, kind: input, shape index: {}]   ;;  %s4001_s3 = inlined_call_operand.vmem [shape: f32[8,8], index: 3, kind: input, shape index: {}]   ;;  %s4002_s4 = inlined_call_operand.vmem [shape: f32[2,1,32], index: 4, kind: input, shape index: {}]   ;;  %s4003_s5 = inlined_call_operand.vmem [shape: bf16[2,4,32,40], index: 5, kind: input, shape index: {}]   ;;  %s4004_s6 = inlined_call_operand.vmem [shape: bf16[2,4,8,32], index: 6, kind: input, shape index: {}]   ;;  %s4005_s7 = inlined_call_operand.vmem [shape: f32[2,1,32], index: 7, kind: input, shape index: {}]   ;;  %s4006_s8 = inlined_call_operand.vmem [shape: bf16[2,32,128], index: 8, kind: input, shape index: {}]   ;;  %s4007_s9 = inlined_call_operand.vmem [shape: bf16[2,64,32], index: 9, kind: input, shape index: {}]   ;;  %s4008_s10 = inlined_call_operand.vmem [shape: f32[1,32], index: 10, kind: input, shape index: {}]   ;;  %s4009_s11 = inlined_call_operand.vmem [shape: bf16[32,128], index: 11, kind: input, shape index: {}]   ;;  %s4010_s12 = inlined_call_operand.vmem [shape: f32[1,128], index: 12, kind: input, shape index: {}]   ;;  %s4011_s13 = inlined_call_operand.vmem [shape: f32[2,1,128], index: 13, kind: output, shape index: {}]  }
   0x1 LB: > { %s2830_s26 = sadd.s32 4294967295, %s3397_s25   ;;  %p2834_p0 = scmp.ge.s32.totalorder %s3397_s25, 1  ;;  %s3397_s25 = sphi %s3478_s25, %s23_s25  }
   0x2   : > { %p395_p1 = scmp.lt.s32.totalorder %s3397_s25, 3 }
   0x4   : > { %p396_p2 = pnand %p2834_p0, %p395_p1 }
   0x5   : > { %p440_p3 = scmp.lt.s32.totalorder (!%p396_p2), %s2830_s26, 1  ;;  %s3401_s29 = smov (!%p396_p2), 16  }
   0x6   : > { %399 = sbr.rel (%p396_p2) target bundleno = 4481 (0x1181), region = 72  ;;  %s3403_s14 = smov (!%p396_p2), 8  }
   0x7   : > { %s3404_s28 = smov (!%p396_p2), 120   ;;  %s3407_s15 = smov (!%p396_p2), 64  }
   0xb   : > { %s4013_s26 = smov (!%p440_p3, %s2830_s26), 1  ;;  %vm458_vm0 = vcmask 261120   ;;  %v3311_v3 = vld [vmem:[%s4003_s5 + $0x8] sm:$0xff]   ;;  %v3312_v4 = vld [vmem:[%s4003_s5 + $0x18] sm:$0xff]   ;;  %v3399_v5 = vmov 0.0   ;;  %v3313_v6 = vld [vmem:[%s4003_s5] sm:$0xff]  }
   0xc   : > { %s2835_s27 = sshll.u32 %s4013_s26, 3  ;;  %3038 = vmatprep.subr.bf16.mxu0 %v3399_v5  ;;  %3046 = vmatprep.subr.bf16.mxu1 %v3399_v5  ;;  %v3314_v7 = vld [vmem:[%s4003_s5 + $0x10] sm:$0xff]   ;;  %vm3400_vm1 = vmmov 0   ;;  %v3524_v8 = vld [vmem:[%s4000_s2] sm:$0xff]  ;;  %v3315_v17 = vld [vmem:[%s4003_s5 + $0x28] sm:$0xff]   ;;  %vm784_vm2 = vcmask 64512   ;;  %s450_s22 = scalar_lea.vmem %s4011_s13, %s4013_s26 }
   0xd   : > { %s443_s30 = scalar_lea.vmem %s3998_s0, %s2835_s27  ;;  %3039 = vmatpush3.bf16.msra.mxu0 %v3311_v3  ;;  %3047 = vmatpush3.bf16.msra.mxu1 %v3312_v4  ;;  %v455_v9 = vld [vmem:[%s4001_s3] sm:$0xff]  ;;  %v3316_v18 = vld [vmem:[%s4003_s5 + $0x38] sm:$0xff]   ;;  %v3318_v21 = vld [vmem:[%s4003_s5 + $0x30] sm:$0xff]   ;;  %vm1020_vm3 = vcmask 1043456   ;;  %s447_s16 = scalar_lea.vmem %s3999_s1, %s2835_s27  ;;  %vm1532_vm4 = vcmask 523264   ;;  %vm2690_vm5 = vcmask 261127  }
   0xe   : > { %v3494_v0 = vld [vmem:[%s443_s30] sm:$0xff]  ;;  %3040 = vmatprep.subr.bf16.mxu0 %v3399_v5  ;;  %3048 = vmatprep.subr.bf16.mxu1 %v3399_v5  ;;  %s3402_s30 = smov 24  }
   0xf   : > { %v457_v1 = vmul.f32 %v3494_v0, %v3494_v0  ;;  %3042 = vmatprep.mubr.msk.bf16.mxu0 %vm3400_vm1, %v3399_v5  ;;  %3050 = vmatprep.mubr.msk.bf16.mxu1 %vm3400_vm1, %v3399_v5  ;;  %v2837_v14 = vld [vmem:[%s4002_s4] ss:$0 sm:$0xff] }
  0x10   : > { %739 = vrot.lane.b32.xlu1 %v3524_v8, %s3401_s29  ;;  %v3317_v20 = vld [vmem:[%s4003_s5 + $0x20] sm:$0xff]   ;;  %s3405_s29 = smov 96  }
  0x11   : > { %v459_v2 = vsel %vm458_vm0, %v457_v1, 0.0  ;;  %3041 = vmatpush3.bf16.msra.mxu0 %v3313_v6  ;;  %3049 = vmatpush3.bf16.msra.mxu1 %v3314_v7 }
  0x12   : > { %460 = vadd.xlane.f32.xlu0 %v459_v2  ;;  %3054 = vmatprep.subr.bf16.mxu0 %v3399_v5 }
  0x13   : > { %3062 = vmatprep.subr.bf16.mxu1 %v3399_v5 }
  0x14   : > { %707 = vrot.lane.b32.xlu1 %v455_v9, %s3403_s14 }
  0x28   : > { %746 = vrot.lane.b32.xlu0 %v455_v9, %s3402_s30  ;;  %s3406_s30 = smov 112  }
  0x82   : > { %v3562_v22 = vpop.permute.xlu1 %739 }
  0x86   : > { %v3564_v23 = vpop.permute.xlu1 %707 }
  0x9b   : > { %v461_v10 = vpop.xlane.xlu0 %460 }
  0x9c   : > { %v463_v11 = vmul.f32 0.03125, %v461_v10 }
  0x9e   : > { %v464_v12 = vadd.f32 1e-06, %v463_v11 }
  0x9f   : > { %v3566_v24 = vpop.permute.xlu0 %746 }
  0xa0   : > { %3341 = vrsqrt.f32 %v464_v12 }
  0xad   : > { %v3342_v13 = vpop.eup %3341 }
  0xae   : > { %v466_v15 = vmul.f32 %v3342_v13, %v3494_v0 }
  0xb0   : > { %v473_v16 = vmul.f32 %v2837_v14, %v466_v15 }
  0xb2   : > { %v474_v19 = vpack.c.bf16 %v473_v16, %v473_v16 }
  0xb4   : > { %3043 = vmatmul.mubr.msk.bf16.vlgmr.msra.gmra.mxu0 %vm458_vm0, %v474_v19  ;;  %3051 = vmatmul.mubr.msk.bf16.vlgmr.msra.gmra.mxu1 %vm458_vm0, %v474_v19 }
  0xb5   : > { %3055 = vmatpush3.bf16.msra.mxu0 %v3315_v17  ;;  %3063 = vmatpush3.bf16.msra.mxu1 %v3316_v18 }
  0xb6   : > { %3056 = vmatprep.subr.bf16.mxu0 %v3399_v5  ;;  %3064 = vmatprep.subr.bf16.mxu1 %v3399_v5 }
  0xb7   : > { %3058 = vmatprep.mubr.msk.bf16.mxu0 %vm3400_vm1, %v3399_v5  ;;  %3066 = vmatprep.mubr.msk.bf16.mxu1 %vm3400_vm1, %v3399_v5 }
  0xb9   : > { %3057 = vmatpush3.bf16.msra.mxu0 %v3317_v20  ;;  %3065 = vmatpush3.bf16.msra.mxu1 %v3318_v21 }
  0xba   : > { %3070 = vmatprep.subr.bf16.mxu0 %v3399_v5  ;;  %3076 = vmatprep.subr.bf16.mxu1 %v3399_v5 }
  0xbc   : > { %3059 = vmatmul.mubr.msk.bf16.vlgmr.msra.gmra.mxu0 %vm458_vm0, %v474_v19  ;;  %3067 = vmatmul.mubr.msk.bf16.vlgmr.msra.gmra.mxu1 %vm458_vm0, %v474_v19 }
  0xbd   : > { %3072 = vmatprep.mubr.msk.bf16.mxu0 %vm3400_vm1, %v3399_v5  ;;  %3078 = vmatprep.mubr.msk.bf16.mxu1 %vm3400_vm1, %v3399_v5 }
 0x174   : > { %v540_v25 = vpop.f32.mrf.mxu0  ;;  %v3568_v26 = vpop.f32.mrf.mxu1 }
 0x175   : > { %v710_v27 = vmul.f32 %v3564_v23, %v540_v25  ;;  %v749_v28 = vmul.f32 %v3566_v24, %v540_v25  ;;  %v711_v33 = vmul.f32 %v3564_v23, %v3568_v26  ;;  %v750_v34 = vmul.f32 %v3566_v24, %v3568_v26 }
 0x176   : > { %v3044_v29 = vpop.f32.mrf.mxu0  ;;  %v3052_v30 = vpop.f32.mrf.mxu1  ;;  %v1010_v49 = vpack.c.bf16 %v540_v25, %v540_v25  ;;  %v742_v50 = vmul.f32 %v3562_v22, %v540_v25  ;;  %v743_v54 = vmul.f32 %v3562_v22, %v3568_v26  ;;  %v1011_v3 = vpack.c.bf16 %v3568_v26, %v3568_v26 }
 0x177   : > { %718 = vrot.lane.b32.xlu0 %v710_v27, %s3404_s28  ;;  %757 = vrot.lane.b32.xlu1 %v749_v28, %s3404_s28  ;;  %v702_v7 = vmul.f32 %v540_v25, %v3524_v8  ;;  %v703_v11 = vmul.f32 %v3568_v26, %v3524_v8 }
 0x178   : > { %v543_v31 = vpop.f32.mrf.mxu0  ;;  %v595_v32 = vpop.f32.mrf.mxu1 }
 0x17a   : > { %v3045_v35 = vpop.f32.mrf.mxu0  ;;  %v3053_v36 = vpop.f32.mrf.mxu1 }
 0x17b   : > { %720 = vrot.lane.b32.xlu0 %v711_v33, %s3404_s28  ;;  %759 = vrot.lane.b32.xlu1 %v750_v34, %s3404_s28 }
 0x17c   : > { %v3580_v37 = vpop.f32.mrf.mxu0  ;;  %v3582_v38 = vpop.f32.mrf.mxu1 }
 0x17d   : > { %v712_v39 = vmul.f32 %v3564_v23, %v3580_v37  ;;  %v751_v40 = vmul.f32 %v3566_v24, %v3580_v37  ;;  %v713_v45 = vmul.f32 %v3564_v23, %v3582_v38  ;;  %v752_v46 = vmul.f32 %v3566_v24, %v3582_v38 }
 0x17e   : > { %v3060_v41 = vpop.f32.mrf.mxu0  ;;  %v3068_v42 = vpop.f32.mrf.mxu1  ;;  %v744_v58 = vmul.f32 %v3562_v22, %v3580_v37  ;;  %v745_v62 = vmul.f32 %v3562_v22, %v3582_v38  ;;  %v704_v17 = vmul.f32 %v3580_v37, %v3524_v8  ;;  %v705_v27 = vmul.f32 %v3582_v38, %v3524_v8 }
 0x17f   : > { %722 = vrot.lane.b32.xlu0 %v712_v39, %s3404_s28  ;;  %761 = vrot.lane.b32.xlu1 %v751_v40, %s3404_s28 }
 0x180   : > { %v647_v43 = vpop.f32.mrf.mxu0  ;;  %v699_v44 = vpop.f32.mrf.mxu1 }
 0x181   : > { %v3647_v43 = vld [vmem:[%s447_s16] sm:$0xff] }
 0x182   : > { %v3061_v47 = vpop.f32.mrf.mxu0  ;;  %v3069_v48 = vpop.f32.mrf.mxu1 }
 0x183   : > { %724 = vrot.lane.b32.xlu0 %v713_v45, %s3404_s28  ;;  %763 = vrot.lane.b32.xlu1 %v752_v46, %s3404_s28 }
 0x187   : > { %1015 = vrot.lane.b32.xlu0 %v1010_v49, %s3405_s29 }
 0x1e9   : > { %v758_v51 = vpop.permute.xlu1 %757  ;;  %v719_v4 = vpop.permute.xlu0 %718 }
 0x1ea   : > { %v769_v52 = vadd.f32 %v758_v51, %v742_v50  ;;  %v730_v9 = vadd.f32 %v719_v4, %v702_v7 }
 0x1ec   : > { %v777_v53 = vpack.c.bf16 %v769_v52, %v769_v52  ;;  %v734_v14 = vmul.f32 0.35355338, %v730_v9 }
 0x1ed   : > { %v760_v55 = vpop.permute.xlu1 %759  ;;  %v721_v6 = vpop.permute.xlu0 %720 }
 0x1ee   : > { %v770_v56 = vadd.f32 %v760_v55, %v743_v54  ;;  %782 = vrot.lane.b32.xlu1 %v777_v53, %s3406_s30  ;;  %v731_v15 = vadd.f32 %v721_v6, %v703_v11  ;;  %v773_v19 = vpack.c.bf16 %v734_v14, %v734_v14 }
 0x1f0   : > { %v778_v57 = vpack.c.bf16 %v770_v56, %v770_v56  ;;  %v735_v20 = vmul.f32 0.35355338, %v731_v15  ;;  %v1012_v15 = vpack.c.bf16 %v3580_v37, %v3580_v37 }
 0x1f1   : > { %v762_v59 = vpop.permute.xlu1 %761  ;;  %v723_v13 = vpop.permute.xlu0 %722 }
 0x1f2   : > { %v771_v60 = vadd.f32 %v762_v59, %v744_v58  ;;  %832 = vrot.lane.b32.xlu1 %v778_v57, %s3406_s30  ;;  %v732_v21 = vadd.f32 %v723_v13, %v704_v17  ;;  %v774_v29 = vpack.c.bf16 %v735_v20, %v735_v20 }
 0x1f4   : > { %v779_v61 = vpack.c.bf16 %v771_v60, %v771_v60  ;;  %v736_v30 = vmul.f32 0.35355338, %v732_v21 }
 0x1f5   : > { %v764_v63 = vpop.permute.xlu1 %763  ;;  %v725_v25 = vpop.permute.xlu0 %724 }
 0x1f6   : > { %v772_v1 = vadd.f32 %v764_v63, %v745_v62  ;;  %881 = vrot.lane.b32.xlu1 %v779_v61, %s3406_s30  ;;  %v733_v31 = vadd.f32 %v725_v25, %v705_v27  ;;  %v775_v35 = vpack.c.bf16 %v736_v30, %v736_v30 }
 0x1f8   : > { %v780_v2 = vpack.c.bf16 %v772_v1, %v772_v1  ;;  %v737_v36 = vmul.f32 0.35355338, %v733_v31 }
 0x1f9   : > { %v1016_v34 = vpop.permute.xlu0 %1015 }
 0x1fa   : > { %930 = vrot.lane.b32.xlu1 %v780_v2, %s3406_s30  ;;  %v1022_v39 = vsel %vm1020_vm3, %v1016_v34, 0  ;;  %v776_v41 = vpack.c.bf16 %v737_v36, %v737_v36 }
 0x1fe   : > { %1065 = vrot.lane.b32.xlu1 %v1011_v3, %s3405_s29 }
 0x260   : > { %v783_v10 = vpop.permute.xlu1 %782 }
 0x261   : > { %v789_v12 = vsel %vm784_vm2, %v783_v10, 0 }
 0x262   : > { %3071 = vmatpush3.bf16.xpose.msra.mxu0 %v789_v12 }
 0x263   : > { %3082 = vmatprep.subr.bf16.mxu0 %v3399_v5 }
 0x264   : > { %v833_v16 = vpop.permute.xlu1 %832 }
 0x265   : > { %v838_v18 = vsel %vm784_vm2, %v833_v16, 0  ;;  %v1013_v16 = vpack.c.bf16 %v3582_v38, %v3582_v38 }
 0x266   : > { %3077 = vmatpush3.bf16.xpose.msra.mxu1 %v838_v18 }
 0x267   : > { %3088 = vmatprep.subr.bf16.mxu1 %v3399_v5 }
 0x268   : > { %v882_v26 = vpop.permute.xlu1 %881 }
 0x269   : > { %v887_v28 = vsel %vm784_vm2, %v882_v26, 0  ;;  %3073 = vmatmul.mubr.msk.bf16.vlgmr.msra.gmra.mxu0 %vm784_vm2, %v773_v19 }
 0x26a   : > { %3083 = vmatpush3.bf16.xpose.msra.mxu0 %v887_v28  ;;  %3084 = vmatprep.mubr.msk.bf16.mxu0 %vm3400_vm1, %v3399_v5 }
 0x26b   : > { %3094 = vmatprep.subr.bf16.mxu0 %v3399_v5 }
 0x26c   : > { %v931_v32 = vpop.permute.xlu1 %930 }
 0x26d   : > { %v936_v33 = vsel %vm784_vm2, %v931_v32, 0  ;;  %3079 = vmatmul.mubr.msk.bf16.vlgmr.msra.gmra.mxu1 %vm784_vm2, %v774_v29 }
 0x26e   : > { %3089 = vmatpush3.bf16.xpose.msra.mxu1 %v936_v33  ;;  %3090 = vmatprep.mubr.msk.bf16.mxu1 %vm3400_vm1, %v3399_v5 }
 0x26f   : > { %3100 = vmatprep.subr.bf16.mxu1 %v3399_v5 }
 0x270   : > { %v1066_v40 = vpop.permute.xlu1 %1065 }
 0x271   : > { %3085 = vmatmul.mubr.msk.bf16.vlgmr.msra.gmra.mxu0 %vm784_vm2, %v775_v35  ;;  %v1071_v42 = vsel %vm1020_vm3, %v1066_v40, 0  ;;  %v1215_v40 = vld [vmem:[%s4004_s6] sm:$0xf] }
 0x272   : > { %3095 = vmatpush3.bf16.msra.mxu0 %v1022_v39  ;;  %3096 = vmatprep.mubr.msk.bf16.mxu0 %vm3400_vm1, %v3399_v5 }
 0x273   : > { %3106 = vmatprep.subr.bf16.mxu0 %v3399_v5 }
 0x275   : > { %3091 = vmatmul.mubr.msk.bf16.vlgmr.msra.gmra.mxu1 %vm784_vm2, %v776_v41  ;;  %v1223_v41 = vsel %vm1020_vm3, %v1215_v40, 0 }
 0x276   : > { %3101 = vmatpush3.bf16.msra.mxu1 %v1071_v42  ;;  %3102 = vmatprep.mubr.msk.bf16.mxu1 %vm3400_vm1, %v3399_v5  ;;  %v1216_v42 = vld [vmem:[%s4004_s6 + $0x4] sm:$0xf] }
 0x277   : > { %3112 = vmatprep.subr.bf16.mxu1 %v3399_v5 }
 0x329   : > { %v825_v44 = vpop.f32.mrf.mxu0 }
 0x32a   : > { %v826_v45 = vadd.f32 %v825_v44, %v3647_v43  ;;  %v1269_v44 = vsel %vm1020_vm3, %v1216_v42, 0  ;;  %v2862_v42 = vld [vmem:[%s4005_s7] ss:$0 sm:$0xff] }
 0x32b   : > { %v3074_v46 = vpop.f32.mrf.mxu0 }
 0x32c   : > { %v978_v47 = vmul.f32 1.442695, %v826_v45  ;;  %v1217_v45 = vld [vmem:[%s4004_s6 + $0x8] sm:$0xf] }
 0x32d   : > { %v828_v48 = vpop.f32.mrf.mxu0  ;;  %v874_v49 = vpop.f32.mrf.mxu1 }
 0x32e   : > { %3343 = vpow2.f32 %v978_v47  ;;  %v875_v50 = vadd.f32 %v874_v49, %v3647_v43  ;;  %v1315_v48 = vsel %vm1020_vm3, %v1217_v45, 0 }
 0x32f   : > { %v3075_v51 = vpop.f32.mrf.mxu0  ;;  %v3080_v52 = vpop.f32.mrf.mxu1 }
 0x330   : > { %v980_v53 = vmul.f32 1.442695, %v875_v50  ;;  %v1218_v50 = vld [vmem:[%s4004_s6 + $0xc] sm:$0xf] }
 0x331   : > { %v877_v54 = vpop.f32.mrf.mxu1  ;;  %v923_v55 = vpop.f32.mrf.mxu0 }
 0x332   : > { %3345 = vpow2.f32 %v980_v53  ;;  %v924_v56 = vadd.f32 %v923_v55, %v3647_v43  ;;  %v1361_v54 = vsel %vm1020_vm3, %v1218_v50, 0  ;;  %v3324_v50 = vld [vmem:[%s4007_s9] sm:$0xff]  }
 0x333   : > { %v3081_v57 = vpop.f32.mrf.mxu1  ;;  %v3086_v58 = vpop.f32.mrf.mxu0 }
 0x334   : > { %v982_v59 = vmul.f32 1.442695, %v924_v56 }
 0x335   : > { %v926_v60 = vpop.f32.mrf.mxu0  ;;  %v972_v61 = vpop.f32.mrf.mxu1 }
 0x336   : > { %3347 = vpow2.f32 %v982_v59  ;;  %v973_v62 = vadd.f32 %v972_v61, %v3647_v43 }
 0x337   : > { %v3087_v63 = vpop.f32.mrf.mxu0  ;;  %v3092_v1 = vpop.f32.mrf.mxu1 }
 0x338   : > { %v984_v2 = vmul.f32 1.442695, %v973_v62 }
 0x339   : > { %v975_v3 = vpop.f32.mrf.mxu1 }
 0x33a   : > { %3349 = vpow2.f32 %v984_v2 }
 0x33b   : > { %v3344_v4 = vpop.eup %3343  ;;  %v3093_v6 = vpop.f32.mrf.mxu1 }
 0x33c   : > { %v986_v7 = vsel %vm784_vm2, %v3344_v4, 0.0 }
 0x33d   : > { %987 = vadd.xlane.f32.xlu1 %v986_v7 }
 0x33f   : > { %v3346_v9 = vpop.eup %3345 }
 0x340   : > { %v989_v10 = vsel %vm784_vm2, %v3346_v9, 0.0 }
 0x341   : > { %990 = vadd.xlane.f32.xlu0 %v989_v10 }
 0x343   : > { %v3348_v11 = vpop.eup %3347 }
 0x344   : > { %v992_v12 = vsel %vm784_vm2, %v3348_v11, 0.0 }
 0x345   : > { %993 = vadd.xlane.f32.xlu0 %v992_v12 }
 0x347   : > { %v3350_v13 = vpop.eup %3349 }
 0x348   : > { %v995_v14 = vsel %vm784_vm2, %v3350_v13, 0.0 }
 0x349   : > { %996 = vadd.xlane.f32.xlu1 %v995_v14 }
 0x35a   : > { %1114 = vrot.lane.b32.xlu1 %v1012_v15, %s3405_s29 }
 0x35b   : > { %1163 = vrot.lane.b32.xlu0 %v1013_v16, %s3405_s29 }
 0x3c6   : > { %v988_v17 = vpop.xlane.xlu1 %987 }
 0x3c7   : > { %3351 = vrcp.f32 %v988_v17 }
 0x3ca   : > { %v991_v18 = vpop.xlane.xlu0 %990 }
 0x3cb   : > { %3353 = vrcp.f32 %v991_v18 }
 0x3ce   : > { %v994_v19 = vpop.xlane.xlu0 %993 }
 0x3cf   : > { %3355 = vrcp.f32 %v994_v19 }
 0x3d2   : > { %v997_v20 = vpop.xlane.xlu1 %996  ;;  %v1164_v29 = vpop.permute.xlu0 %1163 }
 0x3d3   : > { %3357 = vrcp.f32 %v997_v20  ;;  %v1169_v32 = vsel %vm1020_vm3, %v1164_v29, 0 }
 0x3d4   : > { %v3352_v21 = vpop.eup %3351 }
 0x3d5   : > { %v1002_v25 = vmul.f32 %v3352_v21, %v3344_v4 }
 0x3d6   : > { %v1115_v26 = vpop.permute.xlu1 %1114 }
 0x3d7   : > { %v1120_v37 = vsel %vm1020_vm3, %v1115_v26, 0  ;;  %v1006_v27 = vpack.c.bf16 %v1002_v25, %v1002_v25 }
 0x3d8   : > { %v3354_v28 = vpop.eup %3353 }
 0x3d9   : > { %3097 = vmatmul.mubr.msk.bf16.vlgmr.msra.gmra.mxu0 %vm784_vm2, %v1006_v27  ;;  %v1003_v38 = vmul.f32 %v3354_v28, %v3346_v9 }
 0x3da   : > { %3107 = vmatpush3.bf16.msra.mxu0 %v1120_v37  ;;  %3108 = vmatprep.mubr.msk.bf16.mxu0 %vm3400_vm1, %v3399_v5 }
 0x3db   : > { %v1007_v30 = vpack.c.bf16 %v1003_v38, %v1003_v38  ;;  %3118 = vmatprep.subr.bf16.mxu0 %v3399_v5 }
 0x3dc   : > { %v3356_v31 = vpop.eup %3355 }
 0x3dd   : > { %3103 = vmatmul.mubr.msk.bf16.vlgmr.msra.gmra.mxu1 %vm784_vm2, %v1007_v30  ;;  %v1004_v33 = vmul.f32 %v3356_v31, %v3348_v11 }
 0x3de   : > { %3113 = vmatpush3.bf16.msra.mxu1 %v1169_v32  ;;  %3114 = vmatprep.mubr.msk.bf16.mxu1 %vm3400_vm1, %v3399_v5 }
 0x3df   : > { %v1008_v34 = vpack.c.bf16 %v1004_v33, %v1004_v33  ;;  %3124 = vmatprep.subr.bf16.mxu1 %v3399_v5 }
 0x3e0   : > { %v3358_v35 = vpop.eup %3357 }
 0x3e1   : > { %3109 = vmatmul.mubr.msk.bf16.vlgmr.msra.gmra.mxu0 %vm784_vm2, %v1008_v34  ;;  %v1005_v36 = vmul.f32 %v3358_v35, %v3350_v13  ;;  %v3319_v35 = vld [vmem:[%s4006_s8 + $0x8] sm:$0xff]  }
 0x3e2   : > { %3120 = vmatprep.mubr.msk.bf16.mxu0 %vm3400_vm1, %v3399_v5  ;;  %3119 = vmatpush3.bf16.msra.mxu0 %v1223_v41 }
 0x3e3   : > { %v1009_v39 = vpack.c.bf16 %v1005_v36, %v1005_v36  ;;  %3130 = vmatprep.subr.bf16.mxu0 %v3399_v5  ;;  %v3320_v36 = vld [vmem:[%s4006_s8] sm:$0xff]  }
 0x3e5   : > { %3115 = vmatmul.mubr.msk.bf16.vlgmr.msra.gmra.mxu1 %vm784_vm2, %v1009_v39 }
 0x3e6   : > { %3126 = vmatprep.mubr.msk.bf16.mxu1 %vm3400_vm1, %v3399_v5  ;;  %3125 = vmatpush3.bf16.msra.mxu1 %v1269_v44 }
 0x3e7   : > { %3136 = vmatprep.subr.bf16.mxu1 %v3399_v5 }
 0x499   : > { %v1058_v46 = vpop.f32.mrf.mxu0 }
 0x49a   : > { %v1211_v47 = vpack.c.bf16 %v1058_v46, %v1058_v46 }
 0x49b   : > { %v3098_v49 = vpop.f32.mrf.mxu0 }
 0x49c   : > { %3121 = vmatmul.mubr.msk.bf16.vlgmr.msra.gmra.mxu0 %vm784_vm2, %v1211_v47  ;;  %v3321_v47 = vld [vmem:[%s4007_s9 + $0x18] sm:$0xff]   ;;  %v3323_v49 = vld [vmem:[%s4007_s9 + $0x8] sm:$0xff]  }
 0x49d   : > { %v1061_v51 = vpop.f32.mrf.mxu0  ;;  %v1107_v52 = vpop.f32.mrf.mxu1  ;;  %3131 = vmatpush3.bf16.msra.mxu0 %v1315_v48  ;;  %3132 = vmatprep.mubr.msk.bf16.mxu0 %vm3400_vm1, %v3399_v5  ;;  %v3322_v48 = vld [vmem:[%s4007_s9 + $0x10] sm:$0xff]  }
 0x49e   : > { %v1212_v53 = vpack.c.bf16 %v1107_v52, %v1107_v52  ;;  %3142 = vmatprep.subr.bf16.mxu0 %v3399_v5 }
 0x49f   : > { %v3099_v55 = vpop.f32.mrf.mxu0  ;;  %v3104_v56 = vpop.f32.mrf.mxu1 }
 0x4a0   : > { %3127 = vmatmul.mubr.msk.bf16.vlgmr.msra.gmra.mxu1 %vm784_vm2, %v1212_v53 }
 0x4a1   : > { %v1110_v57 = vpop.f32.mrf.mxu1  ;;  %v1156_v58 = vpop.f32.mrf.mxu0  ;;  %3137 = vmatpush3.bf16.msra.mxu1 %v1361_v54  ;;  %3138 = vmatprep.mubr.msk.bf16.mxu1 %vm3400_vm1, %v3399_v5 }
 0x4a2   : > { %v1213_v59 = vpack.c.bf16 %v1156_v58, %v1156_v58  ;;  %3150 = vmatprep.subr.bf16.mxu1 %v3399_v5 }
 0x4a3   : > { %v3105_v60 = vpop.f32.mrf.mxu1  ;;  %v3110_v61 = vpop.f32.mrf.mxu0 }
 0x4a4   : > { %3133 = vmatmul.mubr.msk.bf16.vlgmr.msra.gmra.mxu0 %vm784_vm2, %v1213_v59 }
 0x4a5   : > { %v1159_v62 = vpop.f32.mrf.mxu0  ;;  %v1205_v63 = vpop.f32.mrf.mxu1  ;;  %3146 = vmatprep.mubr.msk.bf16.mxu0 %vm3400_vm1, %v3399_v5  ;;  %3143 = vmatpush3.bf16.msra.mxu0 %v3319_v35 }
 0x4a6   : > { %v1214_v1 = vpack.c.bf16 %v1205_v63, %v1205_v63  ;;  %3144 = vmatprep.subr.bf16.mxu0 %v3399_v5 }
 0x4a7   : > { %v3111_v2 = vpop.f32.mrf.mxu0  ;;  %v3116_v3 = vpop.f32.mrf.mxu1 }
 0x4a8   : > { %3139 = vmatmul.mubr.msk.bf16.vlgmr.msra.gmra.mxu1 %vm784_vm2, %v1214_v1 }
 0x4a9   : > { %v1208_v4 = vpop.f32.mrf.mxu1  ;;  %3158 = vmatprep.mubr.msk.bf16.mxu1 %vm3400_vm1, %v3399_v5  ;;  %3145 = vmatpush3.bf16.msra.mxu0 %v3320_v36 }
 0x4aa   : > { %3162 = vmatprep.subr.bf16.mxu0 %v3399_v5  ;;  %3151 = vmatpush3.bf16.msra.mxu1 %v3321_v47 }
 0x4ab   : > { %v3117_v6 = vpop.f32.mrf.mxu1  ;;  %3152 = vmatprep.subr.bf16.mxu1 %v3399_v5 }
 0x4ae   : > { %3153 = vmatpush3.bf16.msra.mxu1 %v3322_v48 }
 0x4af   : > { %3154 = vmatprep.subr.bf16.mxu1 %v3399_v5 }
 0x4b2   : > { %3155 = vmatpush3.bf16.msra.mxu1 %v3323_v49 }
 0x4b3   : > { %3156 = vmatprep.subr.bf16.mxu1 %v3399_v5 }
 0x4b6   : > { %3157 = vmatpush3.bf16.msra.mxu1 %v3324_v50 }
 0x4b7   : > { %3178 = vmatprep.subr.bf16.mxu1 %v3399_v5 }
 0x55c   : > { %v1259_v7 = vpop.f32.mrf.mxu0 }
 0x55d   : > { %v1403_v17 = vsel %vm458_vm0, %v1259_v7, 0.0 }
 0x55e   : > { %v3122_v9 = vpop.f32.mrf.mxu0 }
 0x55f   : > { %v3325_v9 = vld [vmem:[%s4003_s5 + $0x48] sm:$0xff]  }
 0x560   : > { %v1262_v10 = vpop.f32.mrf.mxu0  ;;  %v1305_v11 = vpop.f32.mrf.mxu1 }
 0x561   : > { %v1404_v14 = vsel %vm458_vm0, %v1305_v11, 0.0  ;;  %v3326_v10 = vld [vmem:[%s4003_s5 + $0x68] sm:$0xff]   ;;  %v3327_v11 = vld [vmem:[%s4003_s5 + $0x40] sm:$0xff]  }
 0x562   : > { %v3123_v12 = vpop.f32.mrf.mxu0  ;;  %v3128_v13 = vpop.f32.mrf.mxu1  ;;  %v1405_v19 = vadd.f32 %v1404_v14, %v1403_v17  ;;  %v2873_v17 = vld [vmem:[%s4002_s4 + $0x1] ss:$0 sm:$0xff] }
 0x563   : > { %v3328_v12 = vld [vmem:[%s4003_s5 + $0x60] sm:$0xff]  }
 0x564   : > { %v1308_v15 = vpop.f32.mrf.mxu1  ;;  %v1351_v16 = vpop.f32.mrf.mxu0 }
 0x565   : > { %v1406_v18 = vsel %vm458_vm0, %v1351_v16, 0.0 }
 0x566   : > { %v3129_v20 = vpop.f32.mrf.mxu1  ;;  %v3134_v21 = vpop.f32.mrf.mxu0  ;;  %v1407_v25 = vadd.f32 %v1406_v18, %v1405_v19 }
 0x567   : > { %v3329_v20 = vld [vmem:[%s4003_s5 + $0x58] sm:$0xff]  }
 0x568   : > { %v1354_v26 = vpop.f32.mrf.mxu0  ;;  %v1397_v37 = vpop.f32.mrf.mxu1 }
 0x569   : > { %v1408_v27 = vsel %vm458_vm0, %v1397_v37, 0.0  ;;  %v3331_v26 = vld [vmem:[%s4003_s5 + $0x78] sm:$0xff]   ;;  %v3332_v37 = vld [vmem:[%s4003_s5 + $0x70] sm:$0xff]  }
 0x56a   : > { %v1409_v28 = vadd.f32 %v1408_v27, %v1407_v25  ;;  %v3135_v38 = vpop.f32.mrf.mxu0  ;;  %v3140_v29 = vpop.f32.mrf.mxu1  ;;  %v3330_v25 = vld [vmem:[%s4003_s5 + $0x50] sm:$0xff]  }
 0x56c   : > { %v1410_v30 = vadd.f32 %v1409_v28, %v3494_v0  ;;  %v1400_v31 = vpop.f32.mrf.mxu1 }
 0x56e   : > { %v3141_v32 = vpop.f32.mrf.mxu1  ;;  %v1412_v33 = vmul.f32 %v1410_v30, %v1410_v30 }
 0x570   : > { %v1413_v34 = vsel %vm458_vm0, %v1412_v33, 0.0 }
 0x571   : > { %1414 = vadd.xlane.f32.xlu1 %v1413_v34 }
 0x5fa   : > { %v1415_v0 = vpop.xlane.xlu1 %1414 }
 0x5fb   : > { %v1416_v39 = vmul.f32 0.03125, %v1415_v0 }
 0x5fd   : > { %v1417_v40 = vadd.f32 1e-06, %v1416_v39 }
 0x5ff   : > { %3359 = vrsqrt.f32 %v1417_v40 }
 0x60c   : > { %v3360_v41 = vpop.eup %3359 }
 0x60d   : > { %v1419_v44 = vmul.f32 %v3360_v41, %v1410_v30 }
 0x60f   : > { %v1426_v45 = vmul.f32 %v2862_v42, %v1419_v44 }
 0x611   : > { %v1427_v46 = vpack.c.bf16 %v1426_v45, %v1426_v45 }
 0x613   : > { %3147 = vmatmul.mubr.msk.bf16.vlgmr.msra.gmra.mxu0 %vm458_vm0, %v1427_v46 }
 0x614   : > { %3166 = vmatprep.mubr.msk.bf16.mxu0 %vm3400_vm1, %v3399_v5  ;;  %3163 = vmatpush3.bf16.msra.mxu0 %v3325_v9 }
 0x615   : > { %3164 = vmatprep.subr.bf16.mxu0 %v3399_v5 }
 0x618   : > { %3165 = vmatpush3.bf16.msra.mxu0 %v3327_v11 }
 0x619   : > { %3170 = vmatprep.subr.bf16.mxu0 %v3399_v5 }
 0x6d3   : > { %v1481_v51 = vpop.f32.mrf.mxu0 }
 0x6d4   : > { %1495 = vrot.lane.b32.xlu0 %v1481_v51, %s3407_s15  ;;  %v2866_v55 = vmul.f32 -1.442695, %v1481_v51 }
 0x6d5   : > { %v3148_v52 = vpop.f32.mrf.mxu0 }
 0x6d6   : > { %3361 = vpow2.f32 %v2866_v55 }
 0x6d7   : > { %v1484_v53 = vpop.f32.mrf.mxu0 }
 0x6d9   : > { %v3149_v54 = vpop.f32.mrf.mxu0 }
 0x6e3   : > { %v3362_v56 = vpop.eup %3361 }
 0x6e4   : > { %v1490_v57 = vadd.f32 1.0, %v3362_v56 }
 0x6e6   : > { %3363 = vrcp.f32 %v1490_v57 }
 0x6f3   : > { %v3364_v58 = vpop.eup %3363 }
 0x6f4   : > { %v1493_v59 = vmul.f32 %v3364_v58, %v1481_v51 }
 0x746   : > { %v1496_v60 = vpop.permute.xlu0 %1495 }
 0x747   : > { %v1498_v61 = vmul.f32 %v1496_v60, %v1493_v59 }
 0x749   : > { %v1499_v62 = vpack.c.bf16 %v1498_v61, %v1498_v61 }
 0x74b   : > { %3159 = vmatmul.mubr.msk.bf16.vlgmr.msra.gmra.mxu1 %vm1532_vm4, %v1499_v62 }
 0x74c   : > { %3182 = vmatprep.mubr.msk.bf16.mxu1 %vm3400_vm1, %v3399_v5  ;;  %3179 = vmatpush3.bf16.msra.mxu1 %v3326_v10 }
 0x74d   : > { %3180 = vmatprep.subr.bf16.mxu1 %v3399_v5 }
 0x750   : > { %3181 = vmatpush3.bf16.msra.mxu1 %v3328_v12 }
 0x751   : > { %3194 = vmatprep.subr.bf16.mxu1 %v3399_v5 }
 0x80b   : > { %v1570_v63 = vpop.f32.mrf.mxu1 }
 0x80c   : > { %v3751_v1 = vadd.f32 %v1570_v63, %v1410_v30 }
 0x80d   : > { %v3160_v2 = vpop.f32.mrf.mxu1 }
 0x80e   : > { %v1579_v3 = vmul.f32 %v3751_v1, %v3751_v1 }
 0x80f   : > { %v1573_v4 = vpop.f32.mrf.mxu1 }
 0x810   : > { %v1580_v6 = vsel %vm458_vm0, %v1579_v3, 0.0 }
 0x811   : > { %1581 = vadd.xlane.f32.xlu0 %v1580_v6  ;;  %v3161_v7 = vpop.f32.mrf.mxu1 }
 0x89a   : > { %v1582_v13 = vpop.xlane.xlu0 %1581 }
 0x89b   : > { %v1583_v14 = vmul.f32 0.03125, %v1582_v13 }
 0x89d   : > { %v1584_v15 = vadd.f32 1e-06, %v1583_v14 }
 0x89f   : > { %3365 = vrsqrt.f32 %v1584_v15 }
 0x8ac   : > { %v3366_v16 = vpop.eup %3365 }
 0x8ad   : > { %v1586_v18 = vmul.f32 %v3366_v16, %v3751_v1 }
 0x8af   : > { %v1593_v19 = vmul.f32 %v2873_v17, %v1586_v18 }
 0x8b1   : > { %v1594_v21 = vpack.c.bf16 %v1593_v19, %v1593_v19 }
 0x8b3   : > { %3167 = vmatmul.mubr.msk.bf16.vlgmr.msra.gmra.mxu0 %vm458_vm0, %v1594_v21  ;;  %3183 = vmatmul.mubr.msk.bf16.vlgmr.msra.gmra.mxu1 %vm458_vm0, %v1594_v21 }
 0x8b4   : > { %3171 = vmatpush3.bf16.msra.mxu0 %v3329_v20  ;;  %3174 = vmatprep.mubr.msk.bf16.mxu0 %vm3400_vm1, %v3399_v5 }
 0x8b5   : > { %3172 = vmatprep.subr.bf16.mxu0 %v3399_v5  ;;  %3196 = vmatprep.mubr.msk.bf16.mxu1 %vm3400_vm1, %v3399_v5 }
 0x8b8   : > { %3173 = vmatpush3.bf16.msra.mxu0 %v3330_v25 }
 0x8b9   : > { %3186 = vmatprep.subr.bf16.mxu0 %v3399_v5 }
 0x8bb   : > { %3175 = vmatmul.mubr.msk.bf16.vlgmr.msra.gmra.mxu0 %vm458_vm0, %v1594_v21 }
 0x8bc   : > { %3187 = vmatpush3.bf16.msra.mxu0 %v3331_v26  ;;  %3190 = vmatprep.mubr.msk.bf16.mxu0 %vm3400_vm1, %v3399_v5 }
 0x8bd   : > { %3188 = vmatprep.subr.bf16.mxu0 %v3399_v5 }
 0x8c0   : > { %3189 = vmatpush3.bf16.msra.mxu0 %v3332_v37 }
 0x8c1   : > { %3200 = vmatprep.subr.bf16.mxu0 %v3399_v5 }
 0x8c3   : > { %3191 = vmatmul.mubr.msk.bf16.vlgmr.msra.gmra.mxu0 %vm458_vm0, %v1594_v21 }
 0x8c4   : > { %3202 = vmatprep.mubr.msk.bf16.mxu0 %vm3400_vm1, %v3399_v5 }
 0x973   : > { %v1661_v27 = vpop.f32.mrf.mxu0  ;;  %v3804_v28 = vpop.f32.mrf.mxu1 }
 0x974   : > { %v1859_v38 = vmul.f32 %v1661_v27, %v3566_v24  ;;  %v1861_v33 = vmul.f32 %v3804_v28, %v3566_v24  ;;  %v1827_v47 = vmul.f32 %v1661_v27, %v3564_v23  ;;  %v1829_v50 = vmul.f32 %v3804_v28, %v3564_v23 }
 0x975   : > { %v3168_v29 = vpop.f32.mrf.mxu0  ;;  %v3184_v30 = vpop.f32.mrf.mxu1  ;;  %v2119_v51 = vpack.c.bf16 %v1661_v27, %v1661_v27  ;;  %v1855_v52 = vmul.f32 %v1661_v27, %v3562_v22  ;;  %v1823_v7 = vmul.f32 %v1661_v27, %v3524_v8  ;;  %v1825_v18 = vmul.f32 %v3804_v28, %v3524_v8 }
 0x976   : > { %1867 = vrot.lane.b32.xlu1 %v1859_v38, %s3404_s28 }
 0x977   : > { %v1664_v31 = vpop.f32.mrf.mxu0  ;;  %v1768_v32 = vpop.f32.mrf.mxu1 }
 0x979   : > { %v3169_v34 = vpop.f32.mrf.mxu0  ;;  %v3185_v35 = vpop.f32.mrf.mxu1 }
 0x97a   : > { %1871 = vrot.lane.b32.xlu1 %v1861_v33, %s3404_s28 }
 0x97b   : > { %v3811_v36 = vpop.f32.mrf.mxu0 }
 0x97c   : > { %v1860_v0 = vmul.f32 %v3811_v36, %v3566_v24  ;;  %v1828_v49 = vmul.f32 %v3811_v36, %v3564_v23  ;;  %v1856_v56 = vmul.f32 %v3811_v36, %v3562_v22 }
 0x97d   : > { %v3176_v39 = vpop.f32.mrf.mxu0 }
 0x97e   : > { %1869 = vrot.lane.b32.xlu0 %v1860_v0, %s3404_s28 }
 0x97f   : > { %v1716_v40 = vpop.f32.mrf.mxu0 }
 0x981   : > { %v3177_v41 = vpop.f32.mrf.mxu0 }
 0x983   : > { %v3816_v42 = vpop.f32.mrf.mxu0 }
 0x984   : > { %v1862_v44 = vmul.f32 %v3816_v42, %v3566_v24  ;;  %v1830_v24 = vmul.f32 %v3816_v42, %v3564_v23  ;;  %v1857_v23 = vmul.f32 %v3804_v28, %v3562_v22  ;;  %v1858_v63 = vmul.f32 %v3816_v42, %v3562_v22 }
 0x985   : > { %v3192_v45 = vpop.f32.mrf.mxu0  ;;  %v1824_v22 = vmul.f32 %v3811_v36, %v3524_v8  ;;  %v1826_v37 = vmul.f32 %v3816_v42, %v3524_v8 }
 0x986   : > { %1873 = vrot.lane.b32.xlu1 %v1862_v44, %s3404_s28 }
 0x987   : > { %v1820_v46 = vpop.f32.mrf.mxu0 }
 0x989   : > { %v3193_v48 = vpop.f32.mrf.mxu0 }
 0x98a   : > { %1835 = vrot.lane.b32.xlu1 %v1827_v47, %s3404_s28 }
 0x98e   : > { %1837 = vrot.lane.b32.xlu1 %v1828_v49, %s3404_s28 }
 0x992   : > { %1839 = vrot.lane.b32.xlu1 %v1829_v50, %s3404_s28 }
 0x996   : > { %1841 = vrot.lane.b32.xlu1 %v1830_v24, %s3404_s28 }
 0x99a   : > { %2124 = vrot.lane.b32.xlu1 %v2119_v51, %s3405_s29 }
 0x9e8   : > { %v1868_v53 = vpop.permute.xlu1 %1867 }
 0x9e9   : > { %v1879_v54 = vadd.f32 %v1868_v53, %v1855_v52 }
 0x9eb   : > { %v1887_v55 = vpack.c.bf16 %v1879_v54, %v1879_v54 }
 0x9ec   : > { %v1872_v57 = vpop.permute.xlu1 %1871 }
 0x9ed   : > { %1892 = vrot.lane.b32.xlu0 %v1887_v55, %s3406_s30  ;;  %v1881_v60 = vadd.f32 %v1872_v57, %v1857_v23 }
 0x9ef   : > { %v1889_v62 = vpack.c.bf16 %v1881_v60, %v1881_v60 }
 0x9f0   : > { %v1870_v58 = vpop.permute.xlu0 %1869 }
 0x9f1   : > { %v1880_v59 = vadd.f32 %v1870_v58, %v1856_v56 }
 0x9f3   : > { %v1888_v61 = vpack.c.bf16 %v1880_v59, %v1880_v59 }
 0x9f5   : > { %1941 = vrot.lane.b32.xlu0 %v1888_v61, %s3406_s30 }
 0x9f8   : > { %v1874_v2 = vpop.permute.xlu1 %1873 }
 0x9f9   : > { %v1882_v3 = vadd.f32 %v1874_v2, %v1858_v63  ;;  %1990 = vrot.lane.b32.xlu0 %v1889_v62, %s3406_s30 }
 0x9fb   : > { %v1890_v4 = vpack.c.bf16 %v1882_v3, %v1882_v3 }
 0x9fc   : > { %v1836_v6 = vpop.permute.xlu1 %1835 }
 0x9fd   : > { %2039 = vrot.lane.b32.xlu0 %v1890_v4, %s3406_s30  ;;  %v1847_v9 = vadd.f32 %v1836_v6, %v1823_v7 }
 0x9ff   : > { %v1851_v13 = vmul.f32 0.35355338, %v1847_v9 }
 0xa00   : > { %v1838_v10 = vpop.permute.xlu1 %1837 }
 0xa01   : > { %v1883_v15 = vpack.c.bf16 %v1851_v13, %v1851_v13  ;;  %v1848_v16 = vadd.f32 %v1838_v10, %v1824_v22  ;;  %v2121_v10 = vpack.c.bf16 %v3804_v28, %v3804_v28 }
 0xa03   : > { %v1852_v20 = vmul.f32 0.35355338, %v1848_v16 }
 0xa04   : > { %v1840_v14 = vpop.permute.xlu1 %1839 }
 0xa05   : > { %v1849_v21 = vadd.f32 %v1840_v14, %v1825_v18  ;;  %v1884_v38 = vpack.c.bf16 %v1852_v20, %v1852_v20 }
 0xa07   : > { %v1853_v29 = vmul.f32 0.35355338, %v1849_v21 }
 0xa08   : > { %v1842_v25 = vpop.permute.xlu1 %1841 }
 0xa09   : > { %v1850_v30 = vadd.f32 %v1842_v25, %v1826_v37  ;;  %v1885_v34 = vpack.c.bf16 %v1853_v29, %v1853_v29 }
 0xa0b   : > { %v1854_v8 = vmul.f32 0.35355338, %v1850_v30 }
 0xa0c   : > { %v2125_v33 = vpop.permute.xlu1 %2124 }
 0xa0d   : > { %v2130_v35 = vsel %vm1020_vm3, %v2125_v33, 0  ;;  %v1886_v0 = vpack.c.bf16 %v1854_v8, %v1854_v8  ;;  %v2910_v33 = vld [vmem:[%s4004_s6 + $0x10] sm:$0xf]  ;;  %v2911_v8 = vld [vmem:[%s4004_s6 + $0x14] sm:$0xf] }
 0xa5f   : > { %v1893_v11 = vpop.permute.xlu0 %1892 }
 0xa60   : > { %v1898_v12 = vsel %vm784_vm2, %v1893_v11, 0  ;;  %v2122_v11 = vpack.c.bf16 %v3816_v42, %v3816_v42 }
 0xa61   : > { %3195 = vmatpush3.bf16.xpose.msra.mxu1 %v1898_v12  ;;  %v2120_v12 = vpack.c.bf16 %v3811_v36, %v3811_v36 }
 0xa62   : > { %3206 = vmatprep.subr.bf16.mxu1 %v3399_v5 }
 0xa67   : > { %v1942_v17 = vpop.permute.xlu0 %1941 }
 0xa68   : > { %v1947_v19 = vsel %vm784_vm2, %v1942_v17, 0  ;;  %3197 = vmatmul.mubr.msk.bf16.vlgmr.msra.gmra.mxu1 %vm784_vm2, %v1883_v15 }
 0xa69   : > { %3201 = vmatpush3.bf16.xpose.msra.mxu0 %v1947_v19  ;;  %3208 = vmatprep.mubr.msk.bf16.mxu1 %vm3400_vm1, %v3399_v5 }
 0xa6a   : > { %3212 = vmatprep.subr.bf16.mxu0 %v3399_v5 }
 0xa6b   : > { %v1991_v26 = vpop.permute.xlu0 %1990 }
 0xa6c   : > { %v1996_v27 = vsel %vm784_vm2, %v1991_v26, 0 }
 0xa6d   : > { %3207 = vmatpush3.bf16.xpose.msra.mxu1 %v1996_v27 }
 0xa6e   : > { %3218 = vmatprep.subr.bf16.mxu1 %v3399_v5 }
 0xa6f   : > { %v2040_v31 = vpop.permute.xlu0 %2039 }
 0xa70   : > { %v2045_v32 = vsel %vm784_vm2, %v2040_v31, 0  ;;  %3203 = vmatmul.mubr.msk.bf16.vlgmr.msra.gmra.mxu0 %vm784_vm2, %v1884_v38 }
 0xa71   : > { %3213 = vmatpush3.bf16.xpose.msra.mxu0 %v2045_v32  ;;  %3214 = vmatprep.mubr.msk.bf16.mxu0 %vm3400_vm1, %v3399_v5 }
 0xa72   : > { %3224 = vmatprep.subr.bf16.mxu0 %v3399_v5 }
 0xa74   : > { %3209 = vmatmul.mubr.msk.bf16.vlgmr.msra.gmra.mxu1 %vm784_vm2, %v1885_v34  ;;  %v2332_v34 = vsel %vm1020_vm3, %v2910_v33, 0 }
 0xa75   : > { %3219 = vmatpush3.bf16.msra.mxu1 %v2130_v35  ;;  %3220 = vmatprep.mubr.msk.bf16.mxu1 %vm3400_vm1, %v3399_v5  ;;  %v2378_v35 = vsel %vm1020_vm3, %v2911_v8, 0  ;;  %v3336_v8 = vld [vmem:[%s4007_s9 + $0x30] sm:$0xff]  }
 0xa76   : > { %3230 = vmatprep.subr.bf16.mxu1 %v3399_v5 }
 0xa78   : > { %3215 = vmatmul.mubr.msk.bf16.vlgmr.msra.gmra.mxu0 %vm784_vm2, %v1886_v0  ;;  %v2912_v0 = vld [vmem:[%s4004_s6 + $0x18] sm:$0xf] }
 0xa79   : > { %3226 = vmatprep.mubr.msk.bf16.mxu0 %vm3400_vm1, %v3399_v5 }
 0xb28   : > { %v1934_v39 = vpop.f32.mrf.mxu1 }
 0xb29   : > { %v1935_v40 = vadd.f32 %v1934_v39, %v3647_v43 }
 0xb2a   : > { %v3198_v41 = vpop.f32.mrf.mxu1 }
 0xb2b   : > { %v2087_v44 = vmul.f32 1.442695, %v1935_v40  ;;  %v2424_v41 = vsel %vm1020_vm3, %v2912_v0, 0  ;;  %v3338_v0 = vld [vmem:[%s4007_s9 + $0x20] sm:$0xff]  }
 0xb2c   : > { %v1937_v45 = vpop.f32.mrf.mxu1 }
 0xb2d   : > { %3367 = vpow2.f32 %v2087_v44 }
 0xb2e   : > { %v3199_v46 = vpop.f32.mrf.mxu1 }
 0xb30   : > { %v1983_v47 = vpop.f32.mrf.mxu0 }
 0xb31   : > { %v1984_v48 = vadd.f32 %v1983_v47, %v3647_v43  ;;  %v2913_v47 = vld [vmem:[%s4004_s6 + $0x1c] sm:$0xf] }
 0xb32   : > { %v3204_v49 = vpop.f32.mrf.mxu0 }
 0xb33   : > { %v2089_v50 = vmul.f32 1.442695, %v1984_v48 }
 0xb34   : > { %v1986_v24 = vpop.f32.mrf.mxu0  ;;  %v2032_v51 = vpop.f32.mrf.mxu1 }
 0xb35   : > { %3369 = vpow2.f32 %v2089_v50  ;;  %v2033_v52 = vadd.f32 %v2032_v51, %v3647_v43  ;;  %v2470_v50 = vsel %vm1020_vm3, %v2913_v47, 0 }
 0xb36   : > { %v3205_v53 = vpop.f32.mrf.mxu0  ;;  %v3210_v54 = vpop.f32.mrf.mxu1 }
 0xb37   : > { %v2091_v55 = vmul.f32 1.442695, %v2033_v52 }
 0xb38   : > { %v2035_v56 = vpop.f32.mrf.mxu1  ;;  %v2081_v57 = vpop.f32.mrf.mxu0 }
 0xb39   : > { %3371 = vpow2.f32 %v2091_v55  ;;  %v2082_v58 = vadd.f32 %v2081_v57, %v3647_v43 }
 0xb3a   : > { %v3368_v23 = vpop.eup %3367  ;;  %v3211_v59 = vpop.f32.mrf.mxu1 }
 0xb3b   : > { %v3216_v60 = vpop.f32.mrf.mxu0  ;;  %v2093_v61 = vmul.f32 1.442695, %v2082_v58  ;;  %v2095_v62 = vsel %vm784_vm2, %v3368_v23, 0.0 }
 0xb3c   : > { %2096 = vadd.xlane.f32.xlu0 %v2095_v62 }
 0xb3d   : > { %v2084_v63 = vpop.f32.mrf.mxu0  ;;  %3373 = vpow2.f32 %v2093_v61 }
 0xb3f   : > { %v3217_v2 = vpop.f32.mrf.mxu0 }
 0xb42   : > { %v3370_v3 = vpop.eup %3369 }
 0xb43   : > { %v2098_v4 = vsel %vm784_vm2, %v3370_v3, 0.0 }
 0xb44   : > { %2099 = vadd.xlane.f32.xlu1 %v2098_v4 }
 0xb46   : > { %v3372_v6 = vpop.eup %3371 }
 0xb47   : > { %v2101_v7 = vsel %vm784_vm2, %v3372_v6, 0.0 }
 0xb48   : > { %2102 = vadd.xlane.f32.xlu0 %v2101_v7 }
 0xb4a   : > { %v3374_v9 = vpop.eup %3373 }
 0xb4b   : > { %v2104_v43 = vsel %vm784_vm2, %v3374_v9, 0.0 }
 0xb4c   : > { %2105 = vadd.xlane.f32.xlu0 %v2104_v43 }
 0xb55   : > { %2222 = vrot.lane.b32.xlu1 %v2121_v10, %s3405_s29 }
 0xb59   : > { %2271 = vrot.lane.b32.xlu1 %v2122_v11, %s3405_s29 }
 0xb62   : > { %2173 = vrot.lane.b32.xlu0 %v2120_v12, %s3405_s29 }
 0xbc5   : > { %v2097_v13 = vpop.xlane.xlu0 %2096 }
 0xbc6   : > { %3375 = vrcp.f32 %v2097_v13 }
 0xbcd   : > { %v2100_v22 = vpop.xlane.xlu1 %2099 }
 0xbce   : > { %3377 = vrcp.f32 %v2100_v22 }
 0xbd1   : > { %v2103_v14 = vpop.xlane.xlu0 %2102  ;;  %v2223_v16 = vpop.permute.xlu1 %2222 }
 0xbd2   : > { %3379 = vrcp.f32 %v2103_v14  ;;  %v2228_v42 = vsel %vm1020_vm3, %v2223_v16, 0 }
 0xbd3   : > { %v3376_v15 = vpop.eup %3375 }
 0xbd4   : > { %v2111_v28 = vmul.f32 %v3376_v15, %v3368_v23 }
 0xbd5   : > { %v2106_v17 = vpop.xlane.xlu0 %2105  ;;  %v2272_v25 = vpop.permute.xlu1 %2271 }
 0xbd6   : > { %3381 = vrcp.f32 %v2106_v17  ;;  %v2115_v18 = vpack.c.bf16 %v2111_v28, %v2111_v28  ;;  %v2277_v27 = vsel %vm1020_vm3, %v2272_v25, 0 }
 0xbd8   : > { %3221 = vmatmul.mubr.msk.bf16.vlgmr.msra.gmra.mxu1 %vm784_vm2, %v2115_v18 }
 0xbd9   : > { %3231 = vmatpush3.bf16.msra.mxu1 %v2228_v42  ;;  %v2174_v36 = vpop.permute.xlu0 %2173  ;;  %3232 = vmatprep.mubr.msk.bf16.mxu1 %vm3400_vm1, %v3399_v5 }
 0xbda   : > { %v2179_v19 = vsel %vm1020_vm3, %v2174_v36, 0  ;;  %3242 = vmatprep.subr.bf16.mxu1 %v3399_v5 }
 0xbdb   : > { %v3378_v20 = vpop.eup %3377  ;;  %3225 = vmatpush3.bf16.msra.mxu0 %v2179_v19 }
 0xbdc   : > { %3236 = vmatprep.subr.bf16.mxu0 %v3399_v5  ;;  %v2112_v21 = vmul.f32 %v3378_v20, %v3370_v3 }
 0xbde   : > { %v2116_v26 = vpack.c.bf16 %v2112_v21, %v2112_v21 }
 0xbdf   : > { %v3380_v37 = vpop.eup %3379 }
 0xbe0   : > { %3227 = vmatmul.mubr.msk.bf16.vlgmr.msra.gmra.mxu0 %vm784_vm2, %v2116_v26  ;;  %v2113_v38 = vmul.f32 %v3380_v37, %v3372_v6  ;;  %v3333_v26 = vld [vmem:[%s4006_s8 + $0x18] sm:$0xff]   ;;  %v3334_v37 = vld [vmem:[%s4006_s8 + $0x10] sm:$0xff]  }
 0xbe1   : > { %3237 = vmatpush3.bf16.msra.mxu0 %v2277_v27  ;;  %3238 = vmatprep.mubr.msk.bf16.mxu0 %vm3400_vm1, %v3399_v5 }
 0xbe2   : > { %v2117_v29 = vpack.c.bf16 %v2113_v38, %v2113_v38  ;;  %3248 = vmatprep.subr.bf16.mxu0 %v3399_v5 }
 0xbe3   : > { %v3382_v30 = vpop.eup %3381 }
 0xbe4   : > { %3233 = vmatmul.mubr.msk.bf16.vlgmr.msra.gmra.mxu1 %vm784_vm2, %v2117_v29  ;;  %v2114_v31 = vmul.f32 %v3382_v30, %v3374_v9  ;;  %v2919_v30 = vld [vmem:[%s4005_s7 + $0x1] ss:$0 sm:$0xff] }
 0xbe5   : > { %3244 = vmatprep.mubr.msk.bf16.mxu1 %vm3400_vm1, %v3399_v5  ;;  %3243 = vmatpush3.bf16.msra.mxu1 %v2332_v34  ;;  %v3335_v34 = vld [vmem:[%s4007_s9 + $0x38] sm:$0xff]  }
 0xbe6   : > { %v2118_v32 = vpack.c.bf16 %v2114_v31, %v2114_v31  ;;  %3254 = vmatprep.subr.bf16.mxu1 %v3399_v5 }
 0xbe8   : > { %3239 = vmatmul.mubr.msk.bf16.vlgmr.msra.gmra.mxu0 %vm784_vm2, %v2118_v32 }
 0xbe9   : > { %3250 = vmatprep.mubr.msk.bf16.mxu0 %vm3400_vm1, %v3399_v5  ;;  %3249 = vmatpush3.bf16.msra.mxu0 %v2378_v35  ;;  %v3337_v35 = vld [vmem:[%s4007_s9 + $0x28] sm:$0xff]  }
 0xbea   : > { %3260 = vmatprep.subr.bf16.mxu0 %v3399_v5 }
 0xc98   : > { %v2166_v39 = vpop.f32.mrf.mxu1 }
 0xc99   : > { %v2319_v40 = vpack.c.bf16 %v2166_v39, %v2166_v39 }
 0xc9a   : > { %v3222_v44 = vpop.f32.mrf.mxu1 }
 0xc9b   : > { %3245 = vmatmul.mubr.msk.bf16.vlgmr.msra.gmra.mxu1 %vm784_vm2, %v2319_v40 }
 0xc9c   : > { %v2169_v45 = vpop.f32.mrf.mxu1  ;;  %3255 = vmatpush3.bf16.msra.mxu1 %v2424_v41  ;;  %3256 = vmatprep.mubr.msk.bf16.mxu1 %vm3400_vm1, %v3399_v5 }
 0xc9d   : > { %3266 = vmatprep.subr.bf16.mxu1 %v3399_v5 }
 0xc9e   : > { %v3223_v46 = vpop.f32.mrf.mxu1 }
 0xca0   : > { %v2215_v48 = vpop.f32.mrf.mxu0 }
 0xca1   : > { %v2320_v49 = vpack.c.bf16 %v2215_v48, %v2215_v48 }
 0xca2   : > { %v3228_v24 = vpop.f32.mrf.mxu0 }
 0xca3   : > { %3251 = vmatmul.mubr.msk.bf16.vlgmr.msra.gmra.mxu0 %vm784_vm2, %v2320_v49 }
 0xca4   : > { %v2218_v51 = vpop.f32.mrf.mxu0  ;;  %v2264_v52 = vpop.f32.mrf.mxu1  ;;  %3261 = vmatpush3.bf16.msra.mxu0 %v2470_v50  ;;  %3262 = vmatprep.mubr.msk.bf16.mxu0 %vm3400_vm1, %v3399_v5 }
 0xca5   : > { %v2321_v53 = vpack.c.bf16 %v2264_v52, %v2264_v52  ;;  %3274 = vmatprep.subr.bf16.mxu0 %v3399_v5 }
 0xca6   : > { %v3229_v54 = vpop.f32.mrf.mxu0  ;;  %v3234_v55 = vpop.f32.mrf.mxu1 }
 0xca7   : > { %3257 = vmatmul.mubr.msk.bf16.vlgmr.msra.gmra.mxu1 %vm784_vm2, %v2321_v53 }
 0xca8   : > { %v2267_v56 = vpop.f32.mrf.mxu1  ;;  %v2313_v57 = vpop.f32.mrf.mxu0  ;;  %3270 = vmatprep.mubr.msk.bf16.mxu1 %vm3400_vm1, %v3399_v5  ;;  %3267 = vmatpush3.bf16.msra.mxu1 %v3333_v26 }
 0xca9   : > { %v2322_v58 = vpack.c.bf16 %v2313_v57, %v2313_v57  ;;  %3268 = vmatprep.subr.bf16.mxu1 %v3399_v5 }
 0xcaa   : > { %v3235_v23 = vpop.f32.mrf.mxu1  ;;  %v3240_v59 = vpop.f32.mrf.mxu0 }
 0xcab   : > { %3263 = vmatmul.mubr.msk.bf16.vlgmr.msra.gmra.mxu0 %vm784_vm2, %v2322_v58  ;;  %v3339_v23 = vld [vmem:[%s4009_s11 + $0x8] sm:$0xff]   ;;  %v3340_v59 = vld [vmem:[%s4009_s11] sm:$0xff]  }
 0xcac   : > { %v2316_v60 = vpop.f32.mrf.mxu0  ;;  %3282 = vmatprep.mubr.msk.bf16.mxu0 %vm3400_vm1, %v3399_v5  ;;  %3269 = vmatpush3.bf16.msra.mxu1 %v3334_v37 }
 0xcad   : > { %3286 = vmatprep.subr.bf16.mxu1 %v3399_v5  ;;  %3275 = vmatpush3.bf16.msra.mxu0 %v3335_v34 }
 0xcae   : > { %v3241_v61 = vpop.f32.mrf.mxu0  ;;  %3276 = vmatprep.subr.bf16.mxu0 %v3399_v5 }
 0xcb1   : > { %3277 = vmatpush3.bf16.msra.mxu0 %v3336_v8 }
 0xcb2   : > { %3278 = vmatprep.subr.bf16.mxu0 %v3399_v5 }
 0xcb5   : > { %3279 = vmatpush3.bf16.msra.mxu0 %v3337_v35 }
 0xcb6   : > { %3280 = vmatprep.subr.bf16.mxu0 %v3399_v5 }
 0xcb9   : > { %3281 = vmatpush3.bf16.msra.mxu0 %v3338_v0 }
 0xd5b   : > { %v2368_v62 = vpop.f32.mrf.mxu1 }
 0xd5c   : > { %v2512_v10 = vsel %vm458_vm0, %v2368_v62, 0.0 }
 0xd5d   : > { %v3246_v63 = vpop.f32.mrf.mxu1 }
 0xd5f   : > { %v2371_v2 = vpop.f32.mrf.mxu1 }
 0xd60   : > { %v2941_v2 = vld [vmem:[%s4008_s10] ss:$0 sm:$0xff] }
 0xd61   : > { %v3247_v3 = vpop.f32.mrf.mxu1 }
 0xd63   : > { %v2414_v4 = vpop.f32.mrf.mxu0 }
 0xd64   : > { %v2513_v7 = vsel %vm458_vm0, %v2414_v4, 0.0 }
 0xd65   : > { %v3252_v6 = vpop.f32.mrf.mxu0  ;;  %v2514_v12 = vadd.f32 %v2513_v7, %v2512_v10 }
 0xd67   : > { %v2417_v9 = vpop.f32.mrf.mxu0  ;;  %v2460_v43 = vpop.f32.mrf.mxu1 }
 0xd68   : > { %v2515_v11 = vsel %vm458_vm0, %v2460_v43, 0.0 }
 0xd69   : > { %v3253_v13 = vpop.f32.mrf.mxu0  ;;  %v3258_v22 = vpop.f32.mrf.mxu1  ;;  %v2516_v14 = vadd.f32 %v2515_v11, %v2514_v12 }
 0xd6b   : > { %v2463_v15 = vpop.f32.mrf.mxu1  ;;  %v2506_v28 = vpop.f32.mrf.mxu0 }
 0xd6c   : > { %v2517_v16 = vsel %vm458_vm0, %v2506_v28, 0.0 }
 0xd6d   : > { %v2518_v17 = vadd.f32 %v2517_v16, %v2516_v14  ;;  %v3259_v18 = vpop.f32.mrf.mxu1  ;;  %v3264_v42 = vpop.f32.mrf.mxu0 }
 0xd6f   : > { %v2519_v36 = vadd.f32 %v2518_v17, %v3751_v1  ;;  %v2509_v19 = vpop.f32.mrf.mxu0 }
 0xd71   : > { %v3265_v20 = vpop.f32.mrf.mxu0  ;;  %v2522_v21 = vmul.f32 %v2519_v36, %v2519_v36 }
 0xd73   : > { %v2523_v25 = vsel %vm458_vm0, %v2522_v21, 0.0 }
 0xd74   : > { %2524 = vadd.xlane.f32.xlu0 %v2523_v25 }
 0xdfd   : > { %v2525_v1 = vpop.xlane.xlu0 %2524 }
 0xdfe   : > { %v2526_v27 = vmul.f32 0.03125, %v2525_v1 }
 0xe00   : > { %v2527_v38 = vadd.f32 1e-06, %v2526_v27 }
 0xe02   : > { %3383 = vrsqrt.f32 %v2527_v38 }
 0xe0f   : > { %v3384_v29 = vpop.eup %3383 }
 0xe10   : > { %v2529_v31 = vmul.f32 %v3384_v29, %v2519_v36 }
 0xe12   : > { %v2536_v32 = vmul.f32 %v2919_v30, %v2529_v31 }
 0xe14   : > { %v2537_v33 = vpack.c.bf16 %v2536_v32, %v2536_v32 }
 0xe16   : > { %3271 = vmatmul.mubr.msk.bf16.vlgmr.msra.gmra.mxu1 %vm458_vm0, %v2537_v33 }
 0xe17   : > { %3290 = vmatprep.mubr.msk.bf16.mxu1 %vm3400_vm1, %v3399_v5  ;;  %3287 = vmatpush3.bf16.msra.mxu1 %v3339_v23 }
 0xe18   : > { %3288 = vmatprep.subr.bf16.mxu1 %v3399_v5  ;;  %v2710_v5 = vld [vmem:[%s4010_s12] sm:$0x1] }
 0xe1b   : > { %3289 = vmatpush3.bf16.msra.mxu1 %v3340_v59 }
 0xed6   : > { %v2592_v39 = vpop.f32.mrf.mxu1 }
 0xed7   : > { %2606 = vrot.lane.b32.xlu1 %v2592_v39, %s3407_s15  ;;  %v2927_v45 = vmul.f32 -1.442695, %v2592_v39 }
 0xed8   : > { %v3272_v40 = vpop.f32.mrf.mxu1 }
 0xed9   : > { %3385 = vpow2.f32 %v2927_v45 }
 0xeda   : > { %v2595_v41 = vpop.f32.mrf.mxu1 }
 0xedc   : > { %v3273_v44 = vpop.f32.mrf.mxu1 }
 0xee6   : > { %v3386_v46 = vpop.eup %3385 }
 0xee7   : > { %v2601_v47 = vadd.f32 1.0, %v3386_v46 }
 0xee9   : > { %3387 = vrcp.f32 %v2601_v47 }
 0xef6   : > { %v3388_v48 = vpop.eup %3387 }
 0xef7   : > { %v2604_v49 = vmul.f32 %v3388_v48, %v2592_v39 }
 0xf49   : > { %v2607_v50 = vpop.permute.xlu1 %2606 }
 0xf4a   : > { %v2609_v24 = vmul.f32 %v2607_v50, %v2604_v49 }
 0xf4c   : > { %v2610_v51 = vpack.c.bf16 %v2609_v24, %v2609_v24 }
 0xf4e   : > { %3283 = vmatmul.mubr.msk.bf16.vlgmr.msra.gmra.mxu0 %vm1532_vm4, %v2610_v51 }
0x100e   : > { %v2681_v52 = vpop.f32.mrf.mxu0 }
0x100f   : > { %v2687_v53 = vadd.f32 %v2681_v52, %v2519_v36 }
0x1010   : > { %v3284_v54 = vpop.f32.mrf.mxu0 }
0x1011   : > { %v2689_v55 = vmul.f32 %v2687_v53, %v2687_v53 }
0x1012   : > { %v2684_v56 = vpop.f32.mrf.mxu0 }
0x1013   : > { %v2691_v57 = vsel %vm2690_vm5, %v2689_v55, 0.0 }
0x1014   : > { %2692 = vadd.xlane.f32.xlu1 %v2691_v57  ;;  %v3285_v58 = vpop.f32.mrf.mxu0 }
0x109d   : > { %v2693_v60 = vpop.xlane.xlu1 %2692 }
0x109e   : > { %v2694_v61 = vmul.f32 0.03125, %v2693_v60 }
0x10a0   : > { %v2695_v62 = vadd.f32 1e-06, %v2694_v61 }
0x10a2   : > { %3389 = vrsqrt.f32 %v2695_v62 }
0x10af   : > { %v3390_v63 = vpop.eup %3389 }
0x10b0   : > { %v2697_v3 = vmul.f32 %v3390_v63, %v2687_v53 }
0x10b2   : > { %v2704_v4 = vmul.f32 %v2941_v2, %v2697_v3 }
0x10b4   : > { %v2705_v6 = vpack.c.bf16 %v2704_v4, %v2704_v4 }
0x10b6   : > { %v2712_v7 = vshrl.u32 %v2705_v6, 16 }
0x10b8   : > { %v2714_v9 = vrot.slane %v2712_v7, 3 }
0x10ba   : > { %3291 = vmatmul.mubr.msk.bf16.vlgmr.msra.gmra.mxu1 %vm458_vm0, %v2714_v9 }
0x117a   : > { %v2764_v43 = vpop.f32.mrf.mxu1 }
0x117b   : > { %v2765_v10 = vadd.f32 %v2764_v43, %v2710_v5 }
0x117c   : > { %v3292_v11 = vpop.f32.mrf.mxu1 }
0x117d   : > { %2770 = vst [vmem:[%s450_s22] sm:$0x1] %v2765_v10 }
0x117e   : > { %v2767_v12 = vpop.f32.mrf.mxu1 }
0x1180   : > { %v3293_v13 = vpop.f32.mrf.mxu1 }
0x1181 PF: > { %s23_s25 = sadd.s32 1, %s3397_s25  }
0x1182   : > { %p20_p4 = scmp.ge.s32.totalorder %s23_s25, 4  }
0x1184   :  { %22 = sbr.rel (!%p20_p4) target bundleno = 1 (0x1), region = 111 }

</bundles_post_ra>
